<compile_context>
chip_gen: v5e
topology: v5e:2x2
jax: 0.10.0
libtpu: 0.0.40
codegen_flags: <defaults>
</compile_context>

<pallas_src>
import jax
import jax.numpy as jnp
from jax.experimental import pallas as pl
from jax.experimental.pallas import tpu as pltpu

LANE = 128
TILE = 256   # row tile (tm) == K tile (tk)


def _round_up(x, m):
    return ((x + m - 1) // m) * m


def _pad2(a, rows, cols, dtype=None):
    dtype = a.dtype if dtype is None else dtype
    out = jnp.zeros((rows, cols), dtype)
    return out.at[: a.shape[0], : a.shape[1]].set(a.astype(dtype))


# --------------------------- kernels ---------------------------

def sage_layer1_kernel(a_ref, xk_ref, xs_ref, invd_ref, wl_ref, wr_ref, b_ref,
                       h_ref, acc_ref):
    # a_ref   : [tm, tk]  int8 unnormalized adjacency tile (0/1 counts)
    # xk_ref  : [tk, Dp]  bf16 features (aggregation operand, K tile)
    # xs_ref  : [tm, Dp]  bf16 features of this row tile (self term)
    # invd_ref: [tm, 1]   f32  1/deg for mean aggregation
    # wl/wr   : [Dp, Hp]  bf16 ; b_ref: [1, Hp] f32 ; acc_ref: [tm, Hp] f32
    k = pl.program_id(1)

    @pl.when(k == 0)
    def _():
        acc_ref[...] = jnp.zeros_like(acc_ref)

    acc_ref[...] += jnp.dot(a_ref[...].astype(jnp.bfloat16), xk_ref[...],
                            preferred_element_type=jnp.float32)

    @pl.when(k == pl.num_programs(1) - 1)
    def _():
        agg = (acc_ref[...] * invd_ref[...]).astype(jnp.bfloat16)
        h = (jnp.dot(agg, wl_ref[...], preferred_element_type=jnp.float32)
             + jnp.dot(xs_ref[...], wr_ref[...],
                       preferred_element_type=jnp.float32)
             + b_ref[...])
        # ReLU (+ dropout = identity in eval); emit bf16 directly.
        h_ref[...] = jnp.maximum(h, 0.0).astype(h_ref.dtype)


def sage_layer2_kernel(a_ref, hk_ref, hs_ref, invd_ref, wl_ref, wr_ref, b_ref,
                       w3_ref, b3_ref, o_ref, acc_ref):
    # conv2 (+ReLU) fused with the final Linear (+ReLU).
    k = pl.program_id(1)

    @pl.when(k == 0)
    def _():
        acc_ref[...] = jnp.zeros_like(acc_ref)

    acc_ref[...] += jnp.dot(a_ref[...].astype(jnp.bfloat16), hk_ref[...],
                            preferred_element_type=jnp.float32)

    @pl.when(k == pl.num_programs(1) - 1)
    def _():
        agg = (acc_ref[...] * invd_ref[...]).astype(jnp.bfloat16)
        h2 = (jnp.dot(agg, wl_ref[...], preferred_element_type=jnp.float32)
              + jnp.dot(hs_ref[...], wr_ref[...],
                        preferred_element_type=jnp.float32)
              + b_ref[...])
        h2 = jnp.maximum(h2, 0.0).astype(jnp.bfloat16)
        out = jnp.dot(h2, w3_ref[...],
                      preferred_element_type=jnp.float32) + b3_ref[...]
        o_ref[...] = jnp.maximum(out, 0.0)


# --------------------------- wrapper ---------------------------

def sagenet_forward(x, edge_index, params):
    """x: [N, D_in] f32, edge_index: [2, E] int32 (row 0 = src j, row 1 = dst i)."""
    wl1, bl1, wr1, wl2, bl2, wr2, w3, b3 = params
    n, d_in = x.shape
    hidden = wl1.shape[1]
    out_dim = w3.shape[1]

    dp = _round_up(d_in, LANE)
    hp = _round_up(hidden, LANE)
    op = _round_up(out_dim, LANE)
    tm = tk = TILE
    npad = _round_up(n, TILE)
    grid = (npad // tm, npad // tk)

    # Unnormalized int8 adjacency (scatter-add of edge counts) + f32 1/deg.
    src, dst = edge_index[0], edge_index[1]
    ones8 = jnp.ones(src.shape, jnp.int8)
    adj = jnp.zeros((npad, npad), jnp.int8).at[dst, src].add(ones8)
    deg = jnp.zeros((npad,), jnp.float32).at[dst].add(1.0)
    inv_deg = (1.0 / jnp.where(deg == 0.0, 1.0, deg)).reshape(npad, 1)

    # bf16 padded operands / weights (done once, outside the kernels).
    x_bf = _pad2(x, npad, dp, jnp.bfloat16)
    wl1p = _pad2(wl1, dp, hp, jnp.bfloat16)
    wr1p = _pad2(wr1, dp, hp, jnp.bfloat16)
    b1p = _pad2(bl1, 1, hp)
    wl2p = _pad2(wl2, hp, hp, jnp.bfloat16)
    wr2p = _pad2(wr2, hp, hp, jnp.bfloat16)
    b2p = _pad2(bl2, 1, hp)
    w3p = _pad2(w3, hp, op, jnp.bfloat16)
    b3p = _pad2(b3, 1, op)

    cparams = pltpu.CompilerParams(
        dimension_semantics=("parallel", "arbitrary"),
        vmem_limit_bytes=48 * 1024 * 1024,   # < v7x 64 MiB physical, headroom kept
    )
    row_k = lambda i, k: (i, k)   # adjacency tile
    k_row = lambda i, k: (k, 0)   # aggregation operand (K tile)
    row0 = lambda i, k: (i, 0)    # per-row-tile blocks (self, 1/deg, output)
    full = lambda i, k: (0, 0)    # resident weights / biases

    # ----- layer 1: SAGEConv + ReLU (bf16 output) -----
    h1 = pl.pallas_call(
        sage_layer1_kernel,
        out_shape=jax.ShapeDtypeStruct((npad, hp), jnp.bfloat16),
        grid=grid,
        in_specs=[
            pl.BlockSpec((tm, tk), row_k),   # int8 adjacency tile
            pl.BlockSpec((tk, dp), k_row),   # bf16 x (aggregation)
            pl.BlockSpec((tm, dp), row0),    # bf16 x (self rows)
            pl.BlockSpec((tm, 1), row0),     # f32 1/deg
            pl.BlockSpec((dp, hp), full),    # W_l1 (bf16)
            pl.BlockSpec((dp, hp), full),    # W_r1 (bf16)
            pl.BlockSpec((1, hp), full),     # bias 1 (f32)
        ],
        out_specs=pl.BlockSpec((tm, hp), row0),
        scratch_shapes=[pltpu.VMEM((tm, hp), jnp.float32)],
        compiler_params=cparams,
    )(adj, x_bf, x_bf, inv_deg, wl1p, wr1p, b1p)

    # ----- layer 2: SAGEConv + ReLU + Linear + ReLU -----
    out = pl.pallas_call(
        sage_layer2_kernel,
        out_shape=jax.ShapeDtypeStruct((npad, op), jnp.float32),
        grid=grid,
        in_specs=[
            pl.BlockSpec((tm, tk), row_k),   # int8 adjacency tile
            pl.BlockSpec((tk, hp), k_row),   # bf16 h1 (aggregation)
            pl.BlockSpec((tm, hp), row0),    # bf16 h1 (self rows)
            pl.BlockSpec((tm, 1), row0),     # f32 1/deg
            pl.BlockSpec((hp, hp), full),    # W_l2 (bf16)
            pl.BlockSpec((hp, hp), full),    # W_r2 (bf16)
            pl.BlockSpec((1, hp), full),     # bias 2 (f32)
            pl.BlockSpec((hp, op), full),    # final linear weight (bf16)
            pl.BlockSpec((1, op), full),     # final linear bias (f32)
        ],
        out_specs=pl.BlockSpec((tm, op), row0),
        scratch_shapes=[pltpu.VMEM((tm, hp), jnp.float32)],
        compiler_params=cparams,
    )(adj, h1, h1, inv_deg, wl2p, wr2p, b2p, w3p, b3p)

    return out[:n, :out_dim]


# --------------------------- params / reference ---------------------------

def init_params(key, input_dim, hidden_dim, output_dim):
    """Glorot-style init. Weights stored transposed vs torch.nn.Linear so the
    kernel computes x @ W."""
    def glorot(k, fan_in, fan_out):
        std = (2.0 / (fan_in + fan_out)) ** 0.5
        return std * jax.random.normal(k, (fan_in, fan_out), jnp.float32)

    ks = jax.random.split(key, 6)
    wl1 = glorot(ks[0], input_dim, hidden_dim)
    bl1 = jnp.zeros((1, hidden_dim), jnp.float32) + 0.01
    wr1 = glorot(ks[1], input_dim, hidden_dim)
    wl2 = glorot(ks[2], hidden_dim, hidden_dim)
    bl2 = jnp.zeros((1, hidden_dim), jnp.float32) + 0.01
    wr2 = glorot(ks[3], hidden_dim, hidden_dim)
    w3 = glorot(ks[4], hidden_dim, output_dim)
    b3 = 0.01 * jax.random.normal(ks[5], (1, output_dim), jnp.float32)
    return (wl1, bl1, wr1, wl2, bl2, wr2, w3, b3)


def sagenet_reference(x, edge_index, params):
    """Pure-JAX f32 reference of the PyTorch forward (eval mode)."""
    wl1, bl1, wr1, wl2, bl2, wr2, w3, b3 = params
    n = x.shape[0]
    src, dst = edge_index[0], edge_index[1]
    adj = jnp.zeros((n, n), jnp.float32).at[dst, src].add(1.0)
    deg = adj.sum(axis=1, keepdims=True)
    adj = adj / jnp.where(deg == 0.0, 1.0, deg)
    h1 = jnp.maximum(adj @ x @ wl1 + bl1 + x @ wr1, 0.0)
    h2 = jnp.maximum(adj @ h1 @ wl2 + bl2 + h1 @ wr2, 0.0)
    return jnp.maximum(h2 @ w3 + b3, 0.0)


if __name__ == "__main__":
    input_dim, hidden_dim, output_dim = 8, 32, 16
    num_nodes, num_edges = 16, 48

    key = jax.random.PRNGKey(0)
    k_x, k_src, k_dst, k_p = jax.random.split(key, 4)

    x = jax.random.normal(k_x, (num_nodes, input_dim), jnp.float32)
    src = jax.random.randint(k_src, (num_edges,), 0, num_nodes, jnp.int32)
    dst = jax.random.randint(k_dst, (num_edges,), 0, num_nodes, jnp.int32)
    edge_index = jnp.stack([src, dst], axis=0)          # [2, E]

    params = init_params(k_p, input_dim, hidden_dim, output_dim)

    fwd = jax.jit(sagenet_forward)
    out = fwd(x, edge_index, params)
    jax.block_until_ready(out)

    # correctness checks
    assert out.shape == (num_nodes, output_dim)
    assert out.dtype == jnp.float32
    assert bool(jnp.all(out >= 0.0))
    ref = sagenet_reference(x, edge_index, params)
    assert bool(jnp.allclose(out, ref, rtol=5e-2, atol=5e-2)), (
        float(jnp.max(jnp.abs(out - ref))))
    print("KERNEL_OK")
</pallas_src>

<mosaic_0001>
module attributes {stable_mosaic.version = 11 : i64} {
  func.func @sage_layer1_kernel(%arg0: i32, %arg1: i32, %arg2: memref<256x256xi8, #tpu.memory_space<vmem>>, %arg3: memref<256x128xbf16, #tpu.memory_space<vmem>>, %arg4: memref<256x128xbf16, #tpu.memory_space<vmem>>, %arg5: memref<256x1xf32, #tpu.memory_space<vmem>>, %arg6: memref<128x128xbf16, #tpu.memory_space<vmem>>, %arg7: memref<128x128xbf16, #tpu.memory_space<vmem>>, %arg8: memref<1x128xf32, #tpu.memory_space<vmem>>, %arg9: memref<256x128xbf16, #tpu.memory_space<vmem>>, %arg10: memref<256x128xf32, #tpu.memory_space<vmem>>) attributes {dimension_semantics = [#tpu.dimension_semantics<parallel>, #tpu.dimension_semantics<arbitrary>], iteration_bounds = array<i64: 1, 1>, scalar_prefetch = 0 : i64, scratch_operands = 1 : i64, tpu.core_type = #tpu.core_type<tc>, window_params = [{transform_indices = @transform_0, window_bounds = array<i64: 256, 256>}, {transform_indices = @transform_1, window_bounds = array<i64: 256, 128>}, {transform_indices = @transform_2, window_bounds = array<i64: 256, 128>}, {transform_indices = @transform_3, window_bounds = array<i64: 256, 1>}, {pipeline_mode = #tpu.pipeline_mode<synchronous>, transform_indices = @transform_4, window_bounds = array<i64: 128, 128>}, {pipeline_mode = #tpu.pipeline_mode<synchronous>, transform_indices = @transform_5, window_bounds = array<i64: 128, 128>}, {pipeline_mode = #tpu.pipeline_mode<synchronous>, transform_indices = @transform_6, window_bounds = array<i64: 1, 128>}, {transform_indices = @transform_7, window_bounds = array<i64: 256, 128>}]} {
    %c0_i32 = arith.constant 0 : i32
    %0 = arith.cmpi eq, %arg1, %c0_i32 : i32
    %1 = arith.extui %0 : i1 to i32
    %c0_i32_0 = arith.constant 0 : i32
    %2 = arith.cmpi ne, %1, %c0_i32_0 : i32
    scf.if %2 {
      %cst_10 = arith.constant 0.000000e+00 : f32
      %13 = vector.broadcast %cst_10 : f32 to vector<256x128xf32>
      %c0_11 = arith.constant 0 : index
      %c0_12 = arith.constant 0 : index
      %14 = vector.load %arg10[%c0_11, %c0_12] : memref<256x128xf32, #tpu.memory_space<vmem>>, vector<256x128xf32>
      tpu.vector_store %arg10[%c0_11, %c0_12], %13 {strides = array<i32>} : memref<256x128xf32, #tpu.memory_space<vmem>>, vector<256x128xf32>,
    } else {
    }
    %c0 = arith.constant 0 : index
    %c0_1 = arith.constant 0 : index
    %3 = vector.load %arg10[%c0, %c0_1] : memref<256x128xf32, #tpu.memory_space<vmem>>, vector<256x128xf32>
    %c0_2 = arith.constant 0 : index
    %c0_3 = arith.constant 0 : index
    %4 = vector.load %arg2[%c0_2, %c0_3] : memref<256x256xi8, #tpu.memory_space<vmem>>, vector<256x256xi8>
    %5 = arith.sitofp %4 : vector<256x256xi8> to vector<256x256xbf16>
    %c0_4 = arith.constant 0 : index
    %c0_5 = arith.constant 0 : index
    %6 = vector.load %arg3[%c0_4, %c0_5] : memref<256x128xbf16, #tpu.memory_space<vmem>>, vector<256x128xbf16>
    %cst = arith.constant dense<0.000000e+00> : vector<256x128xf32>
    %7 = tpu.matmul %5, %6, %cst {dimension_numbers = #tpu.dot_dimension_numbers<[1], [0], [0], [1], [0, 0, 1, 1], [], []>} : vector<256x256xbf16>, vector<256x128xbf16>, vector<256x128xf32> -> vector<256x128xf32>
    %8 = arith.addf %3, %7 : vector<256x128xf32>
    %c0_6 = arith.constant 0 : index
    %c0_7 = arith.constant 0 : index
    %9 = vector.load %arg10[%c0_6, %c0_7] : memref<256x128xf32, #tpu.memory_space<vmem>>, vector<256x128xf32>
    tpu.vector_store %arg10[%c0_6, %c0_7], %8 {strides = array<i32>} : memref<256x128xf32, #tpu.memory_space<vmem>>, vector<256x128xf32>,
    %c0_i32_8 = arith.constant 0 : i32
    %10 = arith.cmpi eq, %arg1, %c0_i32_8 : i32
    %11 = arith.extui %10 : i1 to i32
    %c0_i32_9 = arith.constant 0 : i32
    %12 = arith.cmpi ne, %11, %c0_i32_9 : i32
    scf.if %12 {
      %c0_10 = arith.constant 0 : index
      %c0_11 = arith.constant 0 : index
      %13 = vector.load %arg10[%c0_10, %c0_11] : memref<256x128xf32, #tpu.memory_space<vmem>>, vector<256x128xf32>
      %c0_12 = arith.constant 0 : index
      %c0_13 = arith.constant 0 : index
      %14 = vector.load %arg5[%c0_12, %c0_13] : memref<256x1xf32, #tpu.memory_space<vmem>>, vector<256x1xf32>
      %15 = vector.broadcast %14 : vector<256x1xf32> to vector<256x128xf32>
      %16 = arith.mulf %13, %15 : vector<256x128xf32>
      %17 = arith.truncf %16 : vector<256x128xf32> to vector<256x128xbf16>
      %c0_14 = arith.constant 0 : index
      %c0_15 = arith.constant 0 : index
      %18 = vector.load %arg6[%c0_14, %c0_15] : memref<128x128xbf16, #tpu.memory_space<vmem>>, vector<128x128xbf16>
      %cst_16 = arith.constant dense<0.000000e+00> : vector<256x128xf32>
      %19 = tpu.matmul %17, %18, %cst_16 {dimension_numbers = #tpu.dot_dimension_numbers<[1], [0], [0], [1], [0, 0, 1, 1], [], []>} : vector<256x128xbf16>, vector<128x128xbf16>, vector<256x128xf32> -> vector<256x128xf32>
      %c0_17 = arith.constant 0 : index
      %c0_18 = arith.constant 0 : index
      %20 = vector.load %arg4[%c0_17, %c0_18] : memref<256x128xbf16, #tpu.memory_space<vmem>>, vector<256x128xbf16>
      %c0_19 = arith.constant 0 : index
      %c0_20 = arith.constant 0 : index
      %21 = vector.load %arg7[%c0_19, %c0_20] : memref<128x128xbf16, #tpu.memory_space<vmem>>, vector<128x128xbf16>
      %cst_21 = arith.constant dense<0.000000e+00> : vector<256x128xf32>
      %22 = tpu.matmul %20, %21, %cst_21 {dimension_numbers = #tpu.dot_dimension_numbers<[1], [0], [0], [1], [0, 0, 1, 1], [], []>} : vector<256x128xbf16>, vector<128x128xbf16>, vector<256x128xf32> -> vector<256x128xf32>
      %23 = arith.addf %19, %22 : vector<256x128xf32>
      %c0_22 = arith.constant 0 : index
      %c0_23 = arith.constant 0 : index
      %24 = vector.load %arg8[%c0_22, %c0_23] : memref<1x128xf32, #tpu.memory_space<vmem>>, vector<1x128xf32>
      %25 = vector.broadcast %24 : vector<1x128xf32> to vector<256x128xf32>
      %26 = arith.addf %23, %25 : vector<256x128xf32>
      %cst_24 = arith.constant 0.000000e+00 : f32
      %27 = vector.broadcast %cst_24 : f32 to vector<256x128xf32>
      %28 = arith.maximumf %26, %27 : vector<256x128xf32>
      %29 = arith.truncf %28 : vector<256x128xf32> to vector<256x128xbf16>
      %c0_25 = arith.constant 0 : index
      %c0_26 = arith.constant 0 : index
      %30 = vector.load %arg9[%c0_25, %c0_26] : memref<256x128xbf16, #tpu.memory_space<vmem>>, vector<256x128xbf16>
      tpu.vector_store %arg9[%c0_25, %c0_26], %29 {strides = array<i32>} : memref<256x128xbf16, #tpu.memory_space<vmem>>, vector<256x128xbf16>,
    } else {
    }
    return
  }
  func.func @transform_0(%arg0: i32, %arg1: i32) -> (i32, i32) {
    %c0_i32 = arith.constant 0 : i32
    return %arg0, %arg1 : i32, i32
  }
  func.func @transform_1(%arg0: i32, %arg1: i32) -> (i32, i32) {
    %c0_i32 = arith.constant 0 : i32
    %c0_i32_0 = arith.constant 0 : i32
    return %arg1, %c0_i32 : i32, i32
  }
  func.func @transform_2(%arg0: i32, %arg1: i32) -> (i32, i32) {
    %c0_i32 = arith.constant 0 : i32
    %c0_i32_0 = arith.constant 0 : i32
    return %arg0, %c0_i32 : i32, i32
  }
  func.func @transform_3(%arg0: i32, %arg1: i32) -> (i32, i32) {
    %c0_i32 = arith.constant 0 : i32
    %c0_i32_0 = arith.constant 0 : i32
    return %arg0, %c0_i32 : i32, i32
  }
  func.func @transform_4(%arg0: i32, %arg1: i32) -> (i32, i32) {
    %c0_i32 = arith.constant 0 : i32
    %c0_i32_0 = arith.constant 0 : i32
    %c0_i32_1 = arith.constant 0 : i32
    return %c0_i32, %c0_i32_0 : i32, i32
  }
  func.func @transform_5(%arg0: i32, %arg1: i32) -> (i32, i32) {
    %c0_i32 = arith.constant 0 : i32
    %c0_i32_0 = arith.constant 0 : i32
    %c0_i32_1 = arith.constant 0 : i32
    return %c0_i32, %c0_i32_0 : i32, i32
  }
  func.func @transform_6(%arg0: i32, %arg1: i32) -> (i32, i32) {
    %c0_i32 = arith.constant 0 : i32
    %c0_i32_0 = arith.constant 0 : i32
    %c0_i32_1 = arith.constant 0 : i32
    return %c0_i32, %c0_i32_0 : i32, i32
  }
  func.func @transform_7(%arg0: i32, %arg1: i32) -> (i32, i32) {
    %c0_i32 = arith.constant 0 : i32
    %c0_i32_0 = arith.constant 0 : i32
    return %arg0, %c0_i32 : i32, i32
  }
}

module attributes {stable_mosaic.version = 11 : i64} {
  func.func @sage_layer2_kernel(%arg0: i32, %arg1: i32, %arg2: memref<256x256xi8, #tpu.memory_space<vmem>>, %arg3: memref<256x128xbf16, #tpu.memory_space<vmem>>, %arg4: memref<256x128xbf16, #tpu.memory_space<vmem>>, %arg5: memref<256x1xf32, #tpu.memory_space<vmem>>, %arg6: memref<128x128xbf16, #tpu.memory_space<vmem>>, %arg7: memref<128x128xbf16, #tpu.memory_space<vmem>>, %arg8: memref<1x128xf32, #tpu.memory_space<vmem>>, %arg9: memref<128x128xbf16, #tpu.memory_space<vmem>>, %arg10: memref<1x128xf32, #tpu.memory_space<vmem>>, %arg11: memref<256x128xf32, #tpu.memory_space<vmem>>, %arg12: memref<256x128xf32, #tpu.memory_space<vmem>>) attributes {dimension_semantics = [#tpu.dimension_semantics<parallel>, #tpu.dimension_semantics<arbitrary>], iteration_bounds = array<i64: 1, 1>, scalar_prefetch = 0 : i64, scratch_operands = 1 : i64, tpu.core_type = #tpu.core_type<tc>, window_params = [{transform_indices = @transform_0, window_bounds = array<i64: 256, 256>}, {transform_indices = @transform_1, window_bounds = array<i64: 256, 128>}, {transform_indices = @transform_2, window_bounds = array<i64: 256, 128>}, {transform_indices = @transform_3, window_bounds = array<i64: 256, 1>}, {pipeline_mode = #tpu.pipeline_mode<synchronous>, transform_indices = @transform_4, window_bounds = array<i64: 128, 128>}, {pipeline_mode = #tpu.pipeline_mode<synchronous>, transform_indices = @transform_5, window_bounds = array<i64: 128, 128>}, {pipeline_mode = #tpu.pipeline_mode<synchronous>, transform_indices = @transform_6, window_bounds = array<i64: 1, 128>}, {pipeline_mode = #tpu.pipeline_mode<synchronous>, transform_indices = @transform_7, window_bounds = array<i64: 128, 128>}, {pipeline_mode = #tpu.pipeline_mode<synchronous>, transform_indices = @transform_8, window_bounds = array<i64: 1, 128>}, {transform_indices = @transform_9, window_bounds = array<i64: 256, 128>}]} {
    %c0_i32 = arith.constant 0 : i32
    %0 = arith.cmpi eq, %arg1, %c0_i32 : i32
    %1 = arith.extui %0 : i1 to i32
    %c0_i32_0 = arith.constant 0 : i32
    %2 = arith.cmpi ne, %1, %c0_i32_0 : i32
    scf.if %2 {
      %cst_10 = arith.constant 0.000000e+00 : f32
      %13 = vector.broadcast %cst_10 : f32 to vector<256x128xf32>
      %c0_11 = arith.constant 0 : index
      %c0_12 = arith.constant 0 : index
      %14 = vector.load %arg12[%c0_11, %c0_12] : memref<256x128xf32, #tpu.memory_space<vmem>>, vector<256x128xf32>
      tpu.vector_store %arg12[%c0_11, %c0_12], %13 {strides = array<i32>} : memref<256x128xf32, #tpu.memory_space<vmem>>, vector<256x128xf32>,
    } else {
    }
    %c0 = arith.constant 0 : index
    %c0_1 = arith.constant 0 : index
    %3 = vector.load %arg12[%c0, %c0_1] : memref<256x128xf32, #tpu.memory_space<vmem>>, vector<256x128xf32>
    %c0_2 = arith.constant 0 : index
    %c0_3 = arith.constant 0 : index
    %4 = vector.load %arg2[%c0_2, %c0_3] : memref<256x256xi8, #tpu.memory_space<vmem>>, vector<256x256xi8>
    %5 = arith.sitofp %4 : vector<256x256xi8> to vector<256x256xbf16>
    %c0_4 = arith.constant 0 : index
    %c0_5 = arith.constant 0 : index
    %6 = vector.load %arg3[%c0_4, %c0_5] : memref<256x128xbf16, #tpu.memory_space<vmem>>, vector<256x128xbf16>
    %cst = arith.constant dense<0.000000e+00> : vector<256x128xf32>
    %7 = tpu.matmul %5, %6, %cst {dimension_numbers = #tpu.dot_dimension_numbers<[1], [0], [0], [1], [0, 0, 1, 1], [], []>} : vector<256x256xbf16>, vector<256x128xbf16>, vector<256x128xf32> -> vector<256x128xf32>
    %8 = arith.addf %3, %7 : vector<256x128xf32>
    %c0_6 = arith.constant 0 : index
    %c0_7 = arith.constant 0 : index
    %9 = vector.load %arg12[%c0_6, %c0_7] : memref<256x128xf32, #tpu.memory_space<vmem>>, vector<256x128xf32>
    tpu.vector_store %arg12[%c0_6, %c0_7], %8 {strides = array<i32>} : memref<256x128xf32, #tpu.memory_space<vmem>>, vector<256x128xf32>,
    %c0_i32_8 = arith.constant 0 : i32
    %10 = arith.cmpi eq, %arg1, %c0_i32_8 : i32
    %11 = arith.extui %10 : i1 to i32
    %c0_i32_9 = arith.constant 0 : i32
    %12 = arith.cmpi ne, %11, %c0_i32_9 : i32
    scf.if %12 {
      %c0_10 = arith.constant 0 : index
      %c0_11 = arith.constant 0 : index
      %13 = vector.load %arg12[%c0_10, %c0_11] : memref<256x128xf32, #tpu.memory_space<vmem>>, vector<256x128xf32>
      %c0_12 = arith.constant 0 : index
      %c0_13 = arith.constant 0 : index
      %14 = vector.load %arg5[%c0_12, %c0_13] : memref<256x1xf32, #tpu.memory_space<vmem>>, vector<256x1xf32>
      %15 = vector.broadcast %14 : vector<256x1xf32> to vector<256x128xf32>
      %16 = arith.mulf %13, %15 : vector<256x128xf32>
      %17 = arith.truncf %16 : vector<256x128xf32> to vector<256x128xbf16>
      %c0_14 = arith.constant 0 : index
      %c0_15 = arith.constant 0 : index
      %18 = vector.load %arg6[%c0_14, %c0_15] : memref<128x128xbf16, #tpu.memory_space<vmem>>, vector<128x128xbf16>
      %cst_16 = arith.constant dense<0.000000e+00> : vector<256x128xf32>
      %19 = tpu.matmul %17, %18, %cst_16 {dimension_numbers = #tpu.dot_dimension_numbers<[1], [0], [0], [1], [0, 0, 1, 1], [], []>} : vector<256x128xbf16>, vector<128x128xbf16>, vector<256x128xf32> -> vector<256x128xf32>
      %c0_17 = arith.constant 0 : index
      %c0_18 = arith.constant 0 : index
      %20 = vector.load %arg4[%c0_17, %c0_18] : memref<256x128xbf16, #tpu.memory_space<vmem>>, vector<256x128xbf16>
      %c0_19 = arith.constant 0 : index
      %c0_20 = arith.constant 0 : index
      %21 = vector.load %arg7[%c0_19, %c0_20] : memref<128x128xbf16, #tpu.memory_space<vmem>>, vector<128x128xbf16>
      %cst_21 = arith.constant dense<0.000000e+00> : vector<256x128xf32>
      %22 = tpu.matmul %20, %21, %cst_21 {dimension_numbers = #tpu.dot_dimension_numbers<[1], [0], [0], [1], [0, 0, 1, 1], [], []>} : vector<256x128xbf16>, vector<128x128xbf16>, vector<256x128xf32> -> vector<256x128xf32>
      %23 = arith.addf %19, %22 : vector<256x128xf32>
      %c0_22 = arith.constant 0 : index
      %c0_23 = arith.constant 0 : index
      %24 = vector.load %arg8[%c0_22, %c0_23] : memref<1x128xf32, #tpu.memory_space<vmem>>, vector<1x128xf32>
      %25 = vector.broadcast %24 : vector<1x128xf32> to vector<256x128xf32>
      %26 = arith.addf %23, %25 : vector<256x128xf32>
      %cst_24 = arith.constant 0.000000e+00 : f32
      %27 = vector.broadcast %cst_24 : f32 to vector<256x128xf32>
      %28 = arith.maximumf %26, %27 : vector<256x128xf32>
      %29 = arith.truncf %28 : vector<256x128xf32> to vector<256x128xbf16>
      %c0_25 = arith.constant 0 : index
      %c0_26 = arith.constant 0 : index
      %30 = vector.load %arg9[%c0_25, %c0_26] : memref<128x128xbf16, #tpu.memory_space<vmem>>, vector<128x128xbf16>
      %cst_27 = arith.constant dense<0.000000e+00> : vector<256x128xf32>
      %31 = tpu.matmul %29, %30, %cst_27 {dimension_numbers = #tpu.dot_dimension_numbers<[1], [0], [0], [1], [0, 0, 1, 1], [], []>} : vector<256x128xbf16>, vector<128x128xbf16>, vector<256x128xf32> -> vector<256x128xf32>
      %c0_28 = arith.constant 0 : index
      %c0_29 = arith.constant 0 : index
      %32 = vector.load %arg10[%c0_28, %c0_29] : memref<1x128xf32, #tpu.memory_space<vmem>>, vector<1x128xf32>
      %33 = vector.broadcast %32 : vector<1x128xf32> to vector<256x128xf32>
      %34 = arith.addf %31, %33 : vector<256x128xf32>
      %cst_30 = arith.constant 0.000000e+00 : f32
      %35 = vector.broadcast %cst_30 : f32 to vector<256x128xf32>
      %36 = arith.maximumf %34, %35 : vector<256x128xf32>
      %c0_31 = arith.constant 0 : index
      %c0_32 = arith.constant 0 : index
      %37 = vector.load %arg11[%c0_31, %c0_32] : memref<256x128xf32, #tpu.memory_space<vmem>>, vector<256x128xf32>
      tpu.vector_store %arg11[%c0_31, %c0_32], %36 {strides = array<i32>} : memref<256x128xf32, #tpu.memory_space<vmem>>, vector<256x128xf32>,
    } else {
    }
    return
  }
  func.func @transform_0(%arg0: i32, %arg1: i32) -> (i32, i32) {
    %c0_i32 = arith.constant 0 : i32
    return %arg0, %arg1 : i32, i32
  }
  func.func @transform_1(%arg0: i32, %arg1: i32) -> (i32, i32) {
    %c0_i32 = arith.constant 0 : i32
    %c0_i32_0 = arith.constant 0 : i32
    return %arg1, %c0_i32 : i32, i32
  }
  func.func @transform_2(%arg0: i32, %arg1: i32) -> (i32, i32) {
    %c0_i32 = arith.constant 0 : i32
    %c0_i32_0 = arith.constant 0 : i32
    return %arg0, %c0_i32 : i32, i32
  }
  func.func @transform_3(%arg0: i32, %arg1: i32) -> (i32, i32) {
    %c0_i32 = arith.constant 0 : i32
    %c0_i32_0 = arith.constant 0 : i32
    return %arg0, %c0_i32 : i32, i32
  }
  func.func @transform_4(%arg0: i32, %arg1: i32) -> (i32, i32) {
    %c0_i32 = arith.constant 0 : i32
    %c0_i32_0 = arith.constant 0 : i32
    %c0_i32_1 = arith.constant 0 : i32
    return %c0_i32, %c0_i32_0 : i32, i32
  }
  func.func @transform_5(%arg0: i32, %arg1: i32) -> (i32, i32) {
    %c0_i32 = arith.constant 0 : i32
    %c0_i32_0 = arith.constant 0 : i32
    %c0_i32_1 = arith.constant 0 : i32
    return %c0_i32, %c0_i32_0 : i32, i32
  }
  func.func @transform_6(%arg0: i32, %arg1: i32) -> (i32, i32) {
    %c0_i32 = arith.constant 0 : i32
    %c0_i32_0 = arith.constant 0 : i32
    %c0_i32_1 = arith.constant 0 : i32
    return %c0_i32, %c0_i32_0 : i32, i32
  }
  func.func @transform_7(%arg0: i32, %arg1: i32) -> (i32, i32) {
    %c0_i32 = arith.constant 0 : i32
    %c0_i32_0 = arith.constant 0 : i32
    %c0_i32_1 = arith.constant 0 : i32
    return %c0_i32, %c0_i32_0 : i32, i32
  }
  func.func @transform_8(%arg0: i32, %arg1: i32) -> (i32, i32) {
    %c0_i32 = arith.constant 0 : i32
    %c0_i32_0 = arith.constant 0 : i32
    %c0_i32_1 = arith.constant 0 : i32
    return %c0_i32, %c0_i32_0 : i32, i32
  }
  func.func @transform_9(%arg0: i32, %arg1: i32) -> (i32, i32) {
    %c0_i32 = arith.constant 0 : i32
    %c0_i32_0 = arith.constant 0 : i32
    return %arg0, %c0_i32 : i32, i32
  }
}

</mosaic_0001>

<bundles_post_ra>
// kernel: sagenet_forward.2
= control target key start
LH: loop header
LB: loop body
LE: loop exit
PB: predicated region body
PF: predicated region fallthrough
CT: control target
= control target key end

     0   :  { %v1952_v0 = vmov 0   ;;  %s2390_s3 = inlined_call_operand.vmem [shape: f32[256,1], index: 3, kind: input, shape index: {}]   ;;  %s2391_s1 = inlined_call_operand.vmem [shape: bf16[256,128], index: 1, kind: input, shape index: {}, may-alias: {1,2}]   ;;  %s2392_s0 = inlined_call_operand.vmem [shape: s8[256,256], index: 0, kind: input, shape index: {}]   ;;  %s2393_s5 = inlined_call_operand.vmem [shape: bf16[128,128], index: 5, kind: input, shape index: {}]   ;;  %s2394_s4 = inlined_call_operand.vmem [shape: bf16[128,128], index: 4, kind: input, shape index: {}]   ;;  %s2395_s2 = inlined_call_operand.vmem [shape: bf16[256,128], index: 2, kind: input, shape index: {}, may-alias: {1,2}]   ;;  %s2396_s6 = inlined_call_operand.vmem [shape: f32[1,128], index: 6, kind: input, shape index: {}]   ;;  %s2397_s7 = inlined_call_operand.vmem [shape: bf16[256,128], index: 7, kind: output, shape index: {}]  }
   0x1   :  { %1949 = vset.pattern.permute.xlu1 %v1952_v0  ;;  %1948 = vset.pattern.permute.xlu0 %v1952_v0  ;;  %v693_v1 = vld [vmem:[%s2390_s3 + $0x10] sm:$0xff]  ;;  %v691_v2 = vld [vmem:[%s2390_s3] sm:$0xff]  ;;  %v1700_v3 = vld [vmem:[%s2391_s1 + $0x38] sm:$0xff] }
   0x2   :  { %735 = vperm.xlu1 %1949, %v693_v1   ;;  %725 = vperm.xlu0 %1948, %v691_v2   ;;  %v1708_v4 = vld [vmem:[%s2391_s1 + $0x78] sm:$0xff]  ;;  %v1699_v5 = vld [vmem:[%s2391_s1 + $0x30] sm:$0xff]  ;;  %v692_v8 = vld [vmem:[%s2390_s3 + $0x8] sm:$0xff] }
   0x3   :  { %414 = vmatpush.bf16.msra.mxu0 %v1700_v3  ;;  %1950 = vset.pattern.permute.xlu2 %v1952_v0  ;;  %v1707_v6 = vld [vmem:[%s2391_s1 + $0x70] sm:$0xff]  ;;  %v694_v7 = vld [vmem:[%s2390_s3 + $0x18] sm:$0xff]  ;;  %v1698_v9 = vld [vmem:[%s2391_s1 + $0x28] sm:$0xff] }
   0x4   :  { %503 = vmatpush.bf16.msra.mxu1 %v1708_v4  ;;  %v1706_v10 = vld [vmem:[%s2391_s1 + $0x68] sm:$0xff]  ;;  %v695_v11 = vld [vmem:[%s2390_s3 + $0x20] sm:$0xff]  ;;  %v698_v15 = vld [vmem:[%s2390_s3 + $0x38] sm:$0xff] }
   0x5   :  { %745 = vperm.xlu2 %1950, %v695_v11   ;;  %v1697_v12 = vld [vmem:[%s2391_s1 + $0x20] sm:$0xff]  ;;  %v696_v14 = vld [vmem:[%s2390_s3 + $0x28] sm:$0xff]  ;;  %v697_v16 = vld [vmem:[%s2390_s3 + $0x30] sm:$0xff] }
   0x6   :  { %v1705_v13 = vld [vmem:[%s2391_s1 + $0x60] sm:$0xff]  ;;  %v1696_v17 = vld [vmem:[%s2391_s1 + $0x18] sm:$0xff]  ;;  %v1695_v19 = vld [vmem:[%s2391_s1 + $0x10] sm:$0xff] }
   0x7   :  { %415 = vmatpush.bf16.msra.mxu0 %v1699_v5  ;;  %v1704_v18 = vld [vmem:[%s2391_s1 + $0x58] sm:$0xff]  ;;  %v1703_v20 = vld [vmem:[%s2391_s1 + $0x50] sm:$0xff]  ;;  %v1742_v21 = vld [vmem:[%s2392_s0] sm:$0xff]  }
   0x8   :  { %504 = vmatpush.bf16.msra.mxu1 %v1707_v6  ;;  %v699_v22 = vld [vmem:[%s2390_s3 + $0x40] sm:$0xff]  ;;  %v701_v23 = vld [vmem:[%s2390_s3 + $0x50] sm:$0xff]  ;;  %v700_v24 = vld [vmem:[%s2390_s3 + $0x48] sm:$0xff]  ;;  %v1743_v26 = vunpack.c.0.s8 %v1742_v21  ;;  %v1745_v27 = vunpack.c.2.s8 %v1742_v21  ;;  %v1744_v28 = vunpack.c.1.s8 %v1742_v21  ;;  %v1746_v29 = vunpack.c.3.s8 %v1742_v21 }
   0x9   :  { %v1694_v25 = vld [vmem:[%s2391_s1 + $0x8] sm:$0xff]  ;;  %v1693_v31 = vld [vmem:[%s2391_s1] sm:$0xff]  ;;  %v702_v37 = vld [vmem:[%s2390_s3 + $0x58] sm:$0xff] }
   0xa   :  { %740 = vperm.xlu1 %1949, %v694_v7   ;;  %730 = vperm.xlu0 %1948, %v692_v8   ;;  %v1702_v30 = vld [vmem:[%s2391_s1 + $0x48] sm:$0xff]  ;;  %v190_v32 = vcvt.s32.f32 %v1743_v26  ;;  %v192_v33 = vcvt.s32.f32 %v1745_v27  ;;  %v191_v34 = vcvt.s32.f32 %v1744_v28  ;;  %v193_v35 = vcvt.s32.f32 %v1746_v29  ;;  %v1701_v36 = vld [vmem:[%s2391_s1 + $0x40] sm:$0xff]  ;;  %v705_v43 = vld [vmem:[%s2390_s3 + $0x70] sm:$0xff] }
   0xb   :  { %416 = vmatpush.bf16.msra.mxu0 %v1698_v9  ;;  %v704_v38 = vld [vmem:[%s2390_s3 + $0x68] sm:$0xff]  ;;  %v703_v39 = vld [vmem:[%s2390_s3 + $0x60] sm:$0xff]  ;;  %v706_v45 = vld [vmem:[%s2390_s3 + $0x78] sm:$0xff] }
   0xc   :  { %505 = vmatpush.bf16.msra.mxu1 %v1706_v10  ;;  %v254_v40 = vpack.c.bf16 %v192_v33, %v190_v32  ;;  %v255_v41 = vpack.c.bf16 %v193_v35, %v191_v34  ;;  %v1917_v42 = vld [vmem:[%s2392_s0 + $0x8] sm:$0xff]   ;;  %v707_v44 = vld [vmem:[%s2390_s3 + $0x80] sm:$0xff]  ;;  %v710_v55 = vld [vmem:[%s2390_s3 + $0x98] sm:$0xff] }
   0xd   :  { %750 = vperm.xlu2 %1950, %v696_v14   ;;  %v1749_v46 = vunpack.c.0.s8 %v1917_v42  ;;  %v1751_v47 = vunpack.c.2.s8 %v1917_v42  ;;  %v1750_v48 = vunpack.c.1.s8 %v1917_v42  ;;  %v1752_v49 = vunpack.c.3.s8 %v1917_v42  ;;  %v708_v54 = vld [vmem:[%s2390_s3 + $0x88] sm:$0xff]  ;;  %v709_v56 = vld [vmem:[%s2390_s3 + $0x90] sm:$0xff]  ;;  %v711_v60 = vld [vmem:[%s2390_s3 + $0xa0] sm:$0xff] }
   0xe   :  { %v1918_v59 = vld [vmem:[%s2392_s0 + $0x10] sm:$0xff]   ;;  %v712_v62 = vld [vmem:[%s2390_s3 + $0xa8] sm:$0xff]  ;;  %v714_v7 = vld [vmem:[%s2390_s3 + $0xb8] sm:$0xff] }
   0xf   :  { %417 = vmatpush.bf16.msra.mxu0 %v1697_v12  ;;  %v194_v50 = vcvt.s32.f32 %v1749_v46  ;;  %v196_v51 = vcvt.s32.f32 %v1751_v47  ;;  %v195_v52 = vcvt.s32.f32 %v1750_v48  ;;  %v197_v53 = vcvt.s32.f32 %v1752_v49  ;;  %v713_v61 = vld [vmem:[%s2390_s3 + $0xb0] sm:$0xff]  ;;  %v716_v8 = vld [vmem:[%s2390_s3 + $0xc8] sm:$0xff]  ;;  %v715_v9 = vld [vmem:[%s2390_s3 + $0xc0] sm:$0xff] }
  0x10   :  { %506 = vmatpush.bf16.msra.mxu1 %v1705_v13  ;;  %v1755_v63 = vunpack.c.0.s8 %v1918_v59  ;;  %v1757_v0 = vunpack.c.2.s8 %v1918_v59  ;;  %v1756_v1 = vunpack.c.1.s8 %v1918_v59  ;;  %v1758_v2 = vunpack.c.3.s8 %v1918_v59  ;;  %v1919_v12 = vld [vmem:[%s2392_s0 + $0x18] sm:$0xff]   ;;  %v717_v13 = vld [vmem:[%s2390_s3 + $0xd0] sm:$0xff]  ;;  %v719_v14 = vld [vmem:[%s2390_s3 + $0xe0] sm:$0xff] }
  0x11   :  { %v256_v57 = vpack.c.bf16 %v196_v51, %v194_v50  ;;  %v257_v58 = vpack.c.bf16 %v197_v53, %v195_v52  ;;  %v721_v26 = vld [vmem:[%s2390_s3 + $0xf0] sm:$0xff]  ;;  %v1920_v29 = vld [vmem:[%s2392_s0 + $0x20] sm:$0xff]   ;;  %v1738_v51 = vld [vmem:[%s2393_s5 + $0x28] sm:$0xff] }
  0x12   :  { %760 = vperm.xlu1 %1949, %v698_v15   ;;  %755 = vperm.xlu0 %1948, %v697_v16   ;;  %v198_v3 = vcvt.s32.f32 %v1755_v63  ;;  %v200_v4 = vcvt.s32.f32 %v1757_v0  ;;  %v199_v5 = vcvt.s32.f32 %v1756_v1  ;;  %v201_v6 = vcvt.s32.f32 %v1758_v2  ;;  %v718_v15 = vld [vmem:[%s2390_s3 + $0xd8] sm:$0xff]  ;;  %v1739_v42 = vld [vmem:[%s2393_s5 + $0x30] sm:$0xff]  ;;  %v1714_v59 = vld [vmem:[%s2394_s4 + $0x28] sm:$0xff] }
  0x13   :  { %418 = vmatpush.bf16.msra.mxu0 %v1696_v17  ;;  %v1761_v16 = vunpack.c.0.s8 %v1919_v12  ;;  %v1763_v17 = vunpack.c.2.s8 %v1919_v12  ;;  %v1768_v32 = vunpack.c.1.s8 %v1920_v29  ;;  %v1770_v33 = vunpack.c.3.s8 %v1920_v29  ;;  %v1716_v52 = vld [vmem:[%s2394_s4 + $0x38] sm:$0xff]  ;;  %v1735_v0 = vld [vmem:[%s2393_s5 + $0x10] sm:$0xff]  ;;  %v1713_v1 = vld [vmem:[%s2394_s4 + $0x20] sm:$0xff] }
  0x14   :  { %507 = vmatpush.bf16.msra.mxu1 %v1704_v18  ;;  %v258_v10 = vpack.c.bf16 %v200_v4, %v198_v3  ;;  %v259_v11 = vpack.c.bf16 %v201_v6, %v199_v5  ;;  %v1762_v18 = vunpack.c.1.s8 %v1919_v12  ;;  %1276 = vmatpush.bf16.msra.mxu3 %v1716_v52  ;;  %v1734_v6 = vld [vmem:[%s2393_s5 + $0x8] sm:$0xff] }
  0x15   :  { %765 = vperm.xlu2 %1950, %v699_v22   ;;  %v204_v21 = vcvt.s32.f32 %v1763_v17 }
  0x16   :  { %v203_v22 = vcvt.s32.f32 %v1762_v18 }
  0x17   :  { %419 = vmatpush.bf16.msra.mxu0 %v1695_v19  ;;  %v1764_v19 = vunpack.c.3.s8 %v1919_v12  ;;  %v1923_v12 = vld [vmem:[%s2392_s0 + $0x38] sm:$0xff]  }
  0x18   :  { %508 = vmatpush.bf16.msra.mxu1 %v1703_v20  ;;  %v202_v20 = vcvt.s32.f32 %v1761_v16  ;;  %v1787_v16 = vunpack.c.2.s8 %v1923_v12  ;;  %v1786_v17 = vunpack.c.1.s8 %v1923_v12  ;;  %v1788_v18 = vunpack.c.3.s8 %v1923_v12 }
  0x1a   :  { %775 = vperm.xlu1 %1949, %v701_v23   ;;  %770 = vperm.xlu0 %1948, %v700_v24   ;;  %v205_v23 = vcvt.s32.f32 %v1764_v19  ;;  %v720_v24 = vld [vmem:[%s2390_s3 + $0xe8] sm:$0xff]  ;;  %v260_v27 = vpack.c.bf16 %v204_v21, %v202_v20  ;;  %v1709_v19 = vld [vmem:[%s2394_s4] sm:$0xff]  ;;  %v220_v21 = vcvt.s32.f32 %v1787_v16 }
  0x1b   :  { %420 = vmatpush.bf16.msra.mxu0 %v1694_v25  ;;  %v722_v25 = vld [vmem:[%s2390_s3 + $0xf8] sm:$0xff] }
  0x1c   :  { %509 = vmatpush.bf16.msra.mxu1 %v1702_v30  ;;  %v261_v28 = vpack.c.bf16 %v205_v23, %v203_v22  ;;  %v1767_v30 = vunpack.c.0.s8 %v1920_v29  ;;  %v219_v22 = vcvt.s32.f32 %v1786_v17  ;;  %v221_v23 = vcvt.s32.f32 %v1788_v18 }
  0x1d   :  { %780 = vperm.xlu2 %1950, %v702_v37   ;;  %v209_v37 = vcvt.s32.f32 %v1770_v33 }
  0x1e   :  { %v206_v34 = vcvt.s32.f32 %v1767_v30 }
  0x1f   :  { %421 = vmatpush.bf16.msra.mxu0 %v1693_v31  ;;  %v1769_v31 = vunpack.c.2.s8 %v1920_v29 }
  0x20   :  { %510 = vmatpush.bf16.msra.mxu1 %v1701_v36  ;;  %v207_v36 = vcvt.s32.f32 %v1768_v32 }
  0x21   :  { %v208_v35 = vcvt.s32.f32 %v1769_v31 }
  0x22   :  { %790 = vperm.xlu1 %1949, %v704_v38   ;;  %785 = vperm.xlu0 %1948, %v703_v39   ;;  %v263_v39 = vpack.c.bf16 %v209_v37, %v207_v36 }
  0x23   :  { %422 = vmatmul.bf16.vlgmr.msra.gmra.mxu0 %v254_v40  ;;  %511 = vmatmul.bf16.vlgmr.msra.gmra.mxu1 %v255_v41  ;;  %v262_v38 = vpack.c.bf16 %v208_v35, %v206_v34  ;;  %v1921_v40 = vld [vmem:[%s2392_s0 + $0x28] sm:$0xff]   ;;  %v1740_v41 = vld [vmem:[%s2393_s5 + $0x38] sm:$0xff] }
  0x24   :  { %1139 = vmatpush.bf16.msra.mxu2 %v1740_v41  ;;  %v1776_v46 = vunpack.c.3.s8 %v1921_v40  ;;  %v1925_v41 = vld [vmem:[%s2392_s0 + $0x48] sm:$0xff]  }
  0x25   :  { %795 = vperm.xlu2 %1950, %v705_v43   ;;  %v1773_v43 = vunpack.c.0.s8 %v1921_v40 }
  0x26   :  { %v213_v50 = vcvt.s32.f32 %v1776_v46  ;;  %v1798_v46 = vunpack.c.1.s8 %v1925_v41 }
  0x27   :  { %v210_v47 = vcvt.s32.f32 %v1773_v43  ;;  %v1797_v43 = vunpack.c.0.s8 %v1925_v41 }
  0x28   :  { %1140 = vmatpush.bf16.msra.mxu2 %v1739_v42  ;;  %v1719_v42 = vld [vmem:[%s2395_s2 + $0x10] sm:$0xff] }
  0x29   :  { %v226_v52 = vcvt.s32.f32 %v1797_v43 }
  0x2a   :  { %805 = vperm.xlu1 %1949, %v707_v44   ;;  %800 = vperm.xlu0 %1948, %v706_v45   ;;  %v1775_v44 = vunpack.c.2.s8 %v1921_v40  ;;  %v1774_v45 = vunpack.c.1.s8 %v1921_v40 }
  0x2c   :  { %v212_v48 = vcvt.s32.f32 %v1775_v44  ;;  %v211_v49 = vcvt.s32.f32 %v1774_v45  ;;  %1141 = vmatpush.bf16.msra.mxu2 %v1738_v51  ;;  %v1799_v44 = vunpack.c.2.s8 %v1925_v41 }
  0x2d   :  { %810 = vperm.xlu2 %1950, %v708_v54  }
  0x2e   :  { %v264_v53 = vpack.c.bf16 %v212_v48, %v210_v47  ;;  %v265_v54 = vpack.c.bf16 %v213_v50, %v211_v49  ;;  %v1800_v47 = vunpack.c.3.s8 %v1925_v41 }
  0x32   :  { %820 = vperm.xlu1 %1949, %v710_v55   ;;  %815 = vperm.xlu0 %1948, %v709_v56   ;;  %v1737_v55 = vld [vmem:[%s2393_s5 + $0x20] sm:$0xff]  ;;  %v1715_v56 = vld [vmem:[%s2394_s4 + $0x30] sm:$0xff] }
  0x33   :  { %427 = vmatmul.bf16.gmra.mxu0 %v256_v57  ;;  %516 = vmatmul.bf16.gmra.mxu1 %v257_v58  ;;  %v1922_v57 = vld [vmem:[%s2392_s0 + $0x30] sm:$0xff]   ;;  %v1736_v58 = vld [vmem:[%s2393_s5 + $0x18] sm:$0xff] }
  0x34   :  { %1142 = vmatpush.bf16.msra.mxu2 %v1737_v55  ;;  %1277 = vmatpush.bf16.msra.mxu3 %v1715_v56  ;;  %v1782_v63 = vunpack.c.3.s8 %v1922_v57  ;;  %v227_v56 = vcvt.s32.f32 %v1798_v46  ;;  %v1722_v46 = vld [vmem:[%s2395_s2 + $0x28] sm:$0xff] }
  0x35   :  { %825 = vperm.xlu2 %1950, %v711_v60   ;;  %v1779_v60 = vunpack.c.0.s8 %v1922_v57 }
  0x36   :  { %v217_v5 = vcvt.s32.f32 %v1782_v63 }
  0x37   :  { %v214_v2 = vcvt.s32.f32 %v1779_v60 }
  0x38   :  { %1143 = vmatpush.bf16.msra.mxu2 %v1736_v58  ;;  %1278 = vmatpush.bf16.msra.mxu3 %v1714_v59 }
  0x3a   :  { %835 = vperm.xlu1 %1949, %v713_v61   ;;  %830 = vperm.xlu0 %1948, %v712_v62   ;;  %v1781_v61 = vunpack.c.2.s8 %v1922_v57  ;;  %v1780_v62 = vunpack.c.1.s8 %v1922_v57  ;;  %v229_v57 = vcvt.s32.f32 %v1800_v47 }
  0x3c   :  { %v216_v3 = vcvt.s32.f32 %v1781_v61  ;;  %v215_v4 = vcvt.s32.f32 %v1780_v62  ;;  %1144 = vmatpush.bf16.msra.mxu2 %v1735_v0  ;;  %1279 = vmatpush.bf16.msra.mxu3 %v1713_v1  ;;  %v273_v61 = vpack.c.bf16 %v229_v57, %v227_v56  ;;  %v1926_v0 = vld [vmem:[%s2392_s0 + $0x50] sm:$0xff]   ;;  %v1720_v1 = vld [vmem:[%s2395_s2 + $0x18] sm:$0xff] }
  0x3d   :  { %840 = vperm.xlu2 %1950, %v714_v7   ;;  %v1712_v7 = vld [vmem:[%s2394_s4 + $0x18] sm:$0xff] }
  0x40   :  { %1145 = vmatpush.bf16.msra.mxu2 %v1734_v6  ;;  %1280 = vmatpush.bf16.msra.mxu3 %v1712_v7  ;;  %v1806_v6 = vunpack.c.3.s8 %v1926_v0 }
  0x42   :  { %850 = vperm.xlu1 %1949, %v716_v8   ;;  %845 = vperm.xlu0 %1948, %v715_v9   ;;  %v266_v8 = vpack.c.bf16 %v216_v3, %v214_v2  ;;  %v267_v9 = vpack.c.bf16 %v217_v5, %v215_v4  ;;  %v1803_v2 = vunpack.c.0.s8 %v1926_v0  ;;  %v1805_v3 = vunpack.c.2.s8 %v1926_v0 }
  0x43   :  { %432 = vmatmul.bf16.gmra.mxu0 %v258_v10  ;;  %521 = vmatmul.bf16.gmra.mxu1 %v259_v11  ;;  %v1733_v10 = vld [vmem:[%s2393_s5] sm:$0xff]  ;;  %v1711_v11 = vld [vmem:[%s2394_s4 + $0x10] sm:$0xff]  ;;  %v1804_v5 = vunpack.c.1.s8 %v1926_v0  ;;  %v233_v16 = vcvt.s32.f32 %v1806_v6 }
  0x44   :  { %1146 = vmatpush.bf16.msra.mxu2 %v1733_v10  ;;  %1281 = vmatpush.bf16.msra.mxu3 %v1711_v11  ;;  %v230_v11 = vcvt.s32.f32 %v1803_v2 }
  0x45   :  { %855 = vperm.xlu2 %1950, %v717_v13   ;;  %v1717_v13 = vld [vmem:[%s2395_s2] sm:$0xff] }
  0x47   :  { %1147 = vmatmul.bf16.vlgmr.msra.gmra.mxu2 %v1717_v13 }
  0x4a   :  { %865 = vperm.xlu1 %1949, %v719_v14   ;;  %860 = vperm.xlu0 %1948, %v718_v15   ;;  %v1710_v14 = vld [vmem:[%s2394_s4 + $0x8] sm:$0xff]  ;;  %v1785_v15 = vunpack.c.0.s8 %v1923_v12  ;;  %v232_v12 = vcvt.s32.f32 %v1805_v3 }
  0x4b   :  { %1282 = vmatpush.bf16.msra.mxu3 %v1710_v14 }
  0x4c   :  { %v218_v20 = vcvt.s32.f32 %v1785_v15  ;;  %v231_v15 = vcvt.s32.f32 %v1804_v5  ;;  %v1723_v5 = vld [vmem:[%s2395_s2 + $0x30] sm:$0xff] }
  0x4d   :  { %870 = vperm.xlu2 %1950, %v720_v24  }
  0x4e   :  { %v268_v24 = vpack.c.bf16 %v220_v21, %v218_v20  ;;  %v275_v20 = vpack.c.bf16 %v233_v16, %v231_v15 }
  0x4f   :  { %1283 = vmatpush.bf16.msra.mxu3 %v1709_v19  ;;  %v274_v19 = vpack.c.bf16 %v232_v12, %v230_v11 }
  0x52   :  { %880 = vperm.xlu1 %1949, %v722_v25   ;;  %875 = vperm.xlu0 %1948, %v721_v26   ;;  %v269_v25 = vpack.c.bf16 %v221_v23, %v219_v22  ;;  %v1924_v26 = vld [vmem:[%s2392_s0 + $0x40] sm:$0xff]   ;;  %v1927_v23 = vld [vmem:[%s2392_s0 + $0x58] sm:$0xff]  }
  0x53   :  { %437 = vmatmul.bf16.gmra.mxu0 %v260_v27  ;;  %526 = vmatmul.bf16.gmra.mxu1 %v261_v28  ;;  %v1718_v27 = vld [vmem:[%s2395_s2 + $0x8] sm:$0xff]  ;;  %v1791_v28 = vunpack.c.0.s8 %v1924_v26  ;;  %v1793_v29 = vunpack.c.2.s8 %v1924_v26  ;;  %v1792_v30 = vunpack.c.1.s8 %v1924_v26  ;;  %v1794_v31 = vunpack.c.3.s8 %v1924_v26 }
  0x54   :  { %v1811_v26 = vunpack.c.2.s8 %v1927_v23 }
  0x55   :  { %v222_v32 = vcvt.s32.f32 %v1791_v28  ;;  %v224_v33 = vcvt.s32.f32 %v1793_v29  ;;  %v223_v34 = vcvt.s32.f32 %v1792_v30  ;;  %v225_v35 = vcvt.s32.f32 %v1794_v31 }
  0x56   :  { %v1810_v28 = vunpack.c.1.s8 %v1927_v23  ;;  %v1812_v29 = vunpack.c.3.s8 %v1927_v23 }
  0x57   :  { %1152 = vmatmul.bf16.gmra.mxu2 %v1718_v27  ;;  %v270_v37 = vpack.c.bf16 %v224_v33, %v222_v32 }
  0x5f   :  { %v746_v18 = vpop.permute.xlu2 %745 }
  0x63   :  { %442 = vmatmul.bf16.gmra.mxu0 %v262_v38  ;;  %531 = vmatmul.bf16.gmra.mxu1 %v263_v39  ;;  %v271_v38 = vpack.c.bf16 %v225_v35, %v223_v34  ;;  %v236_v35 = vcvt.s32.f32 %v1811_v26 }
  0x67   :  { %1157 = vmatmul.bf16.gmra.mxu2 %v1719_v42  ;;  %v751_v33 = vpop.permute.xlu2 %750 }
  0x73   :  { %447 = vmatmul.bf16.gmra.mxu0 %v264_v53  ;;  %536 = vmatmul.bf16.gmra.mxu1 %v265_v54  ;;  %v228_v53 = vcvt.s32.f32 %v1799_v44 }
  0x74   :  { %v726_v36 = vpop.permute.xlu0 %725  ;;  %v736_v59 = vpop.permute.xlu1 %735 }
  0x75   :  { %v272_v60 = vpack.c.bf16 %v228_v53, %v226_v52 }
  0x77   :  { %1162 = vmatmul.bf16.gmra.mxu2 %v1720_v1 }
  0x7c   :  { %v731_v51 = vpop.permute.xlu0 %730  ;;  %v741_v10 = vpop.permute.xlu1 %740 }
  0x83   :  { %452 = vmatmul.bf16.gmra.mxu0 %v266_v8  ;;  %541 = vmatmul.bf16.gmra.mxu1 %v267_v9 }
  0x84   :  { %v756_v56 = vpop.permute.xlu0 %755 }
  0x8c   :  { %v771_v15 = vpop.permute.xlu0 %770 }
  0x93   :  { %457 = vmatmul.bf16.gmra.mxu0 %v268_v24  ;;  %546 = vmatmul.bf16.gmra.mxu1 %v269_v25  ;;  %v1721_v24 = vld [vmem:[%s2395_s2 + $0x20] sm:$0xff]  ;;  %v1809_v25 = vunpack.c.0.s8 %v1927_v23 }
  0x94   :  { %1167 = vmatmul.bf16.gmra.mxu2 %v1721_v24 }
  0x95   :  { %v234_v34 = vcvt.s32.f32 %v1809_v25 }
  0x97   :  { %v276_v41 = vpack.c.bf16 %v236_v35, %v234_v34 }
  0xa0   :  { %v423_v39 = vpop.f32.mrf.mxu0  ;;  %v512_v40 = vpop.f32.mrf.mxu1 }
  0xa1   :  { %v513_v45 = vadd.f32 %v512_v40, %v423_v39  ;;  %v237_v39 = vcvt.s32.f32 %v1812_v29 }
  0xa3   :  { %462 = vmatmul.bf16.gmra.mxu0 %v270_v37  ;;  %551 = vmatmul.bf16.gmra.mxu1 %v271_v38  ;;  %v883_v54 = vmul.f32 %v726_v36, %v513_v45  ;;  %v235_v38 = vcvt.s32.f32 %v1810_v28  ;;  %v1928_v45 = vld [vmem:[%s2392_s0 + $0x60] sm:$0xff]   ;;  %v1724_v28 = vld [vmem:[%s2395_s2 + $0x38] sm:$0xff] }
  0xa4   :  { %v1815_v47 = vunpack.c.0.s8 %v1928_v45  ;;  %1172 = vmatmul.bf16.gmra.mxu2 %v1722_v46 }
  0xa5   :  { %v277_v42 = vpack.c.bf16 %v237_v39, %v235_v38 }
  0xa6   :  { %v238_v57 = vcvt.s32.f32 %v1815_v47 }
  0xa8   :  { %v425_v48 = vpop.f32.mrf.mxu0  ;;  %v514_v49 = vpop.f32.mrf.mxu1 }
  0xa9   :  { %v515_v50 = vadd.f32 %v514_v49, %v425_v48  ;;  %v1817_v48 = vunpack.c.2.s8 %v1928_v45 }
  0xab   :  { %v884_v55 = vmul.f32 %v731_v51, %v515_v50  ;;  %v1816_v50 = vunpack.c.1.s8 %v1928_v45  ;;  %v1818_v51 = vunpack.c.3.s8 %v1928_v45 }
  0xad   :  { %v915_v58 = vpack.c.bf16 %v884_v55, %v883_v54  ;;  %v761_v55 = vpop.permute.xlu1 %760 }
  0xaf   :  { %1284 = vmatmul.bf16.vlgmr.msra.gmra.mxu3 %v915_v58  ;;  %v240_v58 = vcvt.s32.f32 %v1817_v48 }
  0xb0   :  { %v428_v62 = vpop.f32.mrf.mxu0  ;;  %v517_v63 = vpop.f32.mrf.mxu1 }
  0xb1   :  { %v518_v4 = vadd.f32 %v517_v63, %v428_v62  ;;  %v241_v62 = vcvt.s32.f32 %v1818_v51  ;;  %v278_v0 = vpack.c.bf16 %v240_v58, %v238_v57  ;;  %v1725_v51 = vld [vmem:[%s2395_s2 + $0x40] sm:$0xff] }
  0xb3   :  { %467 = vmatmul.bf16.gmra.mxu0 %v272_v60  ;;  %556 = vmatmul.bf16.gmra.mxu1 %v273_v61  ;;  %v885_v13 = vmul.f32 %v736_v59, %v518_v4  ;;  %v239_v61 = vcvt.s32.f32 %v1816_v50  ;;  %v1929_v4 = vld [vmem:[%s2392_s0 + $0x68] sm:$0xff]   ;;  %v1931_v50 = vld [vmem:[%s2392_s0 + $0x78] sm:$0xff]  }
  0xb4   :  { %v1821_v6 = vunpack.c.0.s8 %v1929_v4  ;;  %1177 = vmatmul.bf16.gmra.mxu2 %v1723_v5 }
  0xb5   :  { %v279_v1 = vpack.c.bf16 %v241_v62, %v239_v61  ;;  %v786_v61 = vpop.permute.xlu0 %785 }
  0xb6   :  { %v242_v16 = vcvt.s32.f32 %v1821_v6 }
  0xb8   :  { %v430_v7 = vpop.f32.mrf.mxu0  ;;  %v519_v8 = vpop.f32.mrf.mxu1 }
  0xb9   :  { %v520_v9 = vadd.f32 %v519_v8, %v430_v7  ;;  %v1823_v7 = vunpack.c.2.s8 %v1929_v4 }
  0xbb   :  { %v886_v14 = vmul.f32 %v741_v10, %v520_v9  ;;  %v1822_v9 = vunpack.c.1.s8 %v1929_v4  ;;  %v1824_v10 = vunpack.c.3.s8 %v1929_v4 }
  0xbd   :  { %v916_v17 = vpack.c.bf16 %v886_v14, %v885_v13  ;;  %v766_v14 = vpop.permute.xlu2 %765 }
  0xbf   :  { %1289 = vmatmul.bf16.gmra.mxu3 %v916_v17  ;;  %v244_v17 = vcvt.s32.f32 %v1823_v7 }
  0xc0   :  { %v433_v21 = vpop.f32.mrf.mxu0  ;;  %v522_v22 = vpop.f32.mrf.mxu1 }
  0xc1   :  { %v523_v27 = vadd.f32 %v522_v22, %v433_v21  ;;  %v245_v21 = vcvt.s32.f32 %v1824_v10  ;;  %v280_v23 = vpack.c.bf16 %v244_v17, %v242_v16  ;;  %v801_v17 = vpop.permute.xlu0 %800 }
  0xc3   :  { %472 = vmatmul.bf16.gmra.mxu0 %v274_v19  ;;  %561 = vmatmul.bf16.gmra.mxu1 %v275_v20  ;;  %v887_v36 = vmul.f32 %v746_v18, %v523_v27  ;;  %v243_v20 = vcvt.s32.f32 %v1822_v9  ;;  %v1930_v27 = vld [vmem:[%s2392_s0 + $0x70] sm:$0xff]  }
  0xc4   :  { %v1827_v29 = vunpack.c.0.s8 %v1930_v27  ;;  %1182 = vmatmul.bf16.gmra.mxu2 %v1724_v28 }
  0xc5   :  { %v281_v24 = vpack.c.bf16 %v245_v21, %v243_v20  ;;  %v781_v38 = vpop.permute.xlu2 %780 }
  0xc6   :  { %v246_v39 = vcvt.s32.f32 %v1827_v29 }
  0xc8   :  { %v435_v30 = vpop.f32.mrf.mxu0  ;;  %v524_v31 = vpop.f32.mrf.mxu1 }
  0xc9   :  { %v525_v32 = vadd.f32 %v524_v31, %v435_v30  ;;  %v1829_v30 = vunpack.c.2.s8 %v1930_v27 }
  0xcb   :  { %v888_v37 = vmul.f32 %v751_v33, %v525_v32  ;;  %v1828_v32 = vunpack.c.1.s8 %v1930_v27  ;;  %v1830_v33 = vunpack.c.3.s8 %v1930_v27 }
  0xcd   :  { %v917_v40 = vpack.c.bf16 %v888_v37, %v887_v36  ;;  %v776_v37 = vpop.permute.xlu1 %775 }
  0xcf   :  { %1294 = vmatmul.bf16.gmra.mxu3 %v917_v40  ;;  %v248_v40 = vcvt.s32.f32 %v1829_v30 }
  0xd0   :  { %v438_v43 = vpop.f32.mrf.mxu0  ;;  %v527_v44 = vpop.f32.mrf.mxu1 }
  0xd1   :  { %v528_v49 = vadd.f32 %v527_v44, %v438_v43  ;;  %v247_v43 = vcvt.s32.f32 %v1828_v32  ;;  %v249_v44 = vcvt.s32.f32 %v1830_v33  ;;  %v282_v46 = vpack.c.bf16 %v248_v40, %v246_v39  ;;  %v1728_v40 = vld [vmem:[%s2395_s2 + $0x58] sm:$0xff] }
  0xd3   :  { %477 = vmatmul.bf16.gmra.mxu0 %v276_v41  ;;  %566 = vmatmul.bf16.gmra.mxu1 %v277_v42  ;;  %v889_v59 = vmul.f32 %v756_v56, %v528_v49  ;;  %v283_v47 = vpack.c.bf16 %v249_v44, %v247_v43  ;;  %v1836_v56 = vunpack.c.3.s8 %v1931_v50  ;;  %v2276_v43 = vld [vmem:[%s2396_s6] ss:$0 sm:$0xff] }
  0xd4   :  { %1187 = vmatmul.bf16.gmra.mxu2 %v1725_v51 }
  0xd5   :  { %v253_v4 = vcvt.s32.f32 %v1836_v56 }
  0xd8   :  { %v440_v52 = vpop.f32.mrf.mxu0  ;;  %v529_v53 = vpop.f32.mrf.mxu1 }
  0xd9   :  { %v530_v54 = vadd.f32 %v529_v53, %v440_v52  ;;  %v1833_v52 = vunpack.c.0.s8 %v1931_v50  ;;  %v1835_v53 = vunpack.c.2.s8 %v1931_v50 }
  0xdb   :  { %v890_v60 = vmul.f32 %v761_v55, %v530_v54  ;;  %v1834_v55 = vunpack.c.1.s8 %v1931_v50  ;;  %v250_v62 = vcvt.s32.f32 %v1833_v52 }
  0xdd   :  { %v918_v63 = vpack.c.bf16 %v890_v60, %v889_v59  ;;  %v791_v59 = vpop.permute.xlu1 %790 }
  0xdf   :  { %1299 = vmatmul.bf16.gmra.mxu3 %v918_v63  ;;  %v252_v63 = vcvt.s32.f32 %v1835_v53 }
  0xe0   :  { %v443_v2 = vpop.f32.mrf.mxu0  ;;  %v532_v3 = vpop.f32.mrf.mxu1 }
  0xe1   :  { %v533_v8 = vadd.f32 %v532_v3, %v443_v2  ;;  %v251_v3 = vcvt.s32.f32 %v1834_v55  ;;  %v284_v6 = vpack.c.bf16 %v252_v63, %v250_v62 }
  0xe3   :  { %482 = vmatmul.bf16.gmra.mxu0 %v278_v0  ;;  %571 = vmatmul.bf16.gmra.mxu1 %v279_v1  ;;  %v891_v18 = vmul.f32 %v766_v14, %v533_v8  ;;  %v1148_v0 = vpop.f32.mrf.mxu2  ;;  %v285_v7 = vpack.c.bf16 %v253_v4, %v251_v3 }
  0xe8   :  { %v445_v11 = vpop.f32.mrf.mxu0  ;;  %v534_v12 = vpop.f32.mrf.mxu1 }
  0xe9   :  { %v535_v13 = vadd.f32 %v534_v12, %v445_v11  ;;  %v1726_v11 = vld [vmem:[%s2395_s2 + $0x48] sm:$0xff] }
  0xea   :  { %1192 = vmatmul.bf16.gmra.mxu2 %v1726_v11 }
  0xeb   :  { %v892_v19 = vmul.f32 %v771_v15, %v535_v13  ;;  %v1150_v10 = vpop.f32.mrf.mxu2  ;;  %v796_v15 = vpop.permute.xlu2 %795 }
  0xed   :  { %v919_v22 = vpack.c.bf16 %v892_v19, %v891_v18 }
  0xef   :  { %1304 = vmatmul.bf16.gmra.mxu3 %v919_v22 }
  0xf0   :  { %v448_v25 = vpop.f32.mrf.mxu0  ;;  %v537_v26 = vpop.f32.mrf.mxu1 }
  0xf1   :  { %v538_v31 = vadd.f32 %v537_v26, %v448_v25  ;;  %v1727_v25 = vld [vmem:[%s2395_s2 + $0x50] sm:$0xff] }
  0xf3   :  { %487 = vmatmul.bf16.gmra.mxu0 %v280_v23  ;;  %576 = vmatmul.bf16.gmra.mxu1 %v281_v24  ;;  %v893_v41 = vmul.f32 %v776_v37, %v538_v31  ;;  %v1153_v18 = vpop.f32.mrf.mxu2  ;;  %v811_v29 = vpop.permute.xlu2 %810 }
  0xf4   :  { %v806_v31 = vpop.permute.xlu1 %805 }
  0xf8   :  { %v450_v34 = vpop.f32.mrf.mxu0  ;;  %v539_v35 = vpop.f32.mrf.mxu1 }
  0xf9   :  { %v540_v36 = vadd.f32 %v539_v35, %v450_v34 }
  0xfa   :  { %1197 = vmatmul.bf16.gmra.mxu2 %v1727_v25 }
  0xfb   :  { %v894_v42 = vmul.f32 %v781_v38, %v540_v36  ;;  %v1155_v24 = vpop.f32.mrf.mxu2 }
  0xfd   :  { %v920_v45 = vpack.c.bf16 %v894_v42, %v893_v41 }
  0xff   :  { %1309 = vmatmul.bf16.gmra.mxu3 %v920_v45 }
 0x100   :  { %v453_v48 = vpop.f32.mrf.mxu0  ;;  %v542_v49 = vpop.f32.mrf.mxu1 }
 0x101   :  { %v543_v54 = vadd.f32 %v542_v49, %v453_v48 }
 0x103   :  { %492 = vmatmul.bf16.gmra.mxu0 %v282_v46  ;;  %581 = vmatmul.bf16.gmra.mxu1 %v283_v47  ;;  %v895_v1 = vmul.f32 %v786_v61, %v543_v54  ;;  %v2266_v32 = vpop.f32.mrf.mxu2  ;;  %v821_v46 = vpop.permute.xlu1 %820 }
 0x104   :  { %v816_v47 = vpop.permute.xlu0 %815 }
 0x108   :  { %v455_v57 = vpop.f32.mrf.mxu0  ;;  %v544_v58 = vpop.f32.mrf.mxu1 }
 0x109   :  { %v545_v60 = vadd.f32 %v544_v58, %v455_v57 }
 0x10a   :  { %1202 = vmatmul.bf16.gmra.mxu2 %v1728_v40 }
 0x10b   :  { %v896_v2 = vmul.f32 %v791_v59, %v545_v60  ;;  %v2268_v39 = vpop.f32.mrf.mxu2 }
 0x10d   :  { %v921_v5 = vpack.c.bf16 %v896_v2, %v895_v1 }
 0x10f   :  { %1314 = vmatmul.bf16.gmra.mxu3 %v921_v5  ;;  %v826_v5 = vpop.permute.xlu2 %825 }
 0x110   :  { %v458_v8 = vpop.f32.mrf.mxu0  ;;  %v547_v9 = vpop.f32.mrf.mxu1 }
 0x111   :  { %v548_v12 = vadd.f32 %v547_v9, %v458_v8 }
 0x113   :  { %497 = vmatmul.bf16.gmra.mxu0 %v284_v6  ;;  %586 = vmatmul.bf16.gmra.mxu1 %v285_v7  ;;  %v897_v19 = vmul.f32 %v796_v15, %v548_v12  ;;  %v2278_v50 = vpop.f32.mrf.mxu2  ;;  %v831_v6 = vpop.permute.xlu0 %830 }
 0x118   :  { %v460_v13 = vpop.f32.mrf.mxu0  ;;  %v549_v14 = vpop.f32.mrf.mxu1 }
 0x119   :  { %v550_v16 = vadd.f32 %v549_v14, %v460_v13 }
 0x11b   :  { %v898_v20 = vmul.f32 %v801_v17, %v550_v16  ;;  %v2282_v63 = vpop.f32.mrf.mxu2 }
 0x11d   :  { %v922_v21 = vpack.c.bf16 %v898_v20, %v897_v19 }
 0x11f   :  { %1319 = vmatmul.bf16.gmra.mxu3 %v922_v21 }
 0x120   :  { %v463_v22 = vpop.f32.mrf.mxu0  ;;  %v552_v23 = vpop.f32.mrf.mxu1 }
 0x121   :  { %v553_v26 = vadd.f32 %v552_v23, %v463_v22  ;;  %v1730_v23 = vld [vmem:[%s2395_s2 + $0x68] sm:$0xff] }
 0x123   :  { %v899_v33 = vmul.f32 %v806_v31, %v553_v26  ;;  %v2290_v9 = vpop.f32.mrf.mxu2 }
 0x128   :  { %v465_v27 = vpop.f32.mrf.mxu0  ;;  %v554_v28 = vpop.f32.mrf.mxu1 }
 0x129   :  { %v555_v30 = vadd.f32 %v554_v28, %v465_v27  ;;  %v836_v28 = vpop.permute.xlu1 %835 }
 0x12b   :  { %v900_v34 = vmul.f32 %v811_v29, %v555_v30  ;;  %v2294_v22 = vpop.f32.mrf.mxu2  ;;  %v841_v29 = vpop.permute.xlu2 %840 }
 0x12d   :  { %v923_v35 = vpack.c.bf16 %v900_v34, %v899_v33 }
 0x12f   :  { %1324 = vmatmul.bf16.gmra.mxu3 %v923_v35 }
 0x130   :  { %v468_v36 = vpop.f32.mrf.mxu0  ;;  %v557_v37 = vpop.f32.mrf.mxu1 }
 0x131   :  { %v558_v41 = vadd.f32 %v557_v37, %v468_v36 }
 0x132   :  { %v1285_v38 = vpop.f32.mrf.mxu3 }
 0x133   :  { %v1286_v42 = vadd.f32 %v1285_v38, %v1148_v0  ;;  %v901_v51 = vmul.f32 %v816_v47, %v558_v41  ;;  %v1729_v0 = vld [vmem:[%s2395_s2 + $0x60] sm:$0xff]  ;;  %v2303_v33 = vpop.f32.mrf.mxu2 }
 0x134   :  { %1207 = vmatmul.bf16.gmra.mxu2 %v1729_v0 }
 0x135   :  { %v1369_v52 = vadd.f32 %v2276_v43, %v1286_v42 }
 0x137   :  { %v1401_v57 = vmax.f32 %v1369_v52, 0.0 }
 0x138   :  { %v470_v44 = vpop.f32.mrf.mxu0  ;;  %v559_v45 = vpop.f32.mrf.mxu1 }
 0x139   :  { %v560_v48 = vadd.f32 %v559_v45, %v470_v44 }
 0x13a   :  { %v1287_v49 = vpop.f32.mrf.mxu3 }
 0x13b   :  { %v902_v53 = vmul.f32 %v821_v46, %v560_v48  ;;  %v1288_v54 = vadd.f32 %v1287_v49, %v1150_v10  ;;  %v2308_v47 = vpop.f32.mrf.mxu2 }
 0x13d   :  { %v1370_v55 = vadd.f32 %v2276_v43, %v1288_v54  ;;  %v924_v56 = vpack.c.bf16 %v902_v53, %v901_v51  ;;  %v851_v53 = vpop.permute.xlu1 %850 }
 0x13f   :  { %v1402_v58 = vmax.f32 %v1370_v55, 0.0  ;;  %1329 = vmatmul.bf16.gmra.mxu3 %v924_v56  ;;  %v846_v55 = vpop.permute.xlu0 %845 }
 0x140   :  { %v473_v59 = vpop.f32.mrf.mxu0  ;;  %v562_v60 = vpop.f32.mrf.mxu1 }
 0x141   :  { %v1840_v61 = vpack.c.bf16 %v1402_v58, %v1401_v57  ;;  %v563_v1 = vadd.f32 %v562_v60, %v473_v59 }
 0x142   :  { %v1290_v62 = vpop.f32.mrf.mxu3 }
 0x143   :  { %1841 = vst [vmem:[%s2397_s7] sm:$0xff] %v1840_v61   ;;  %v1291_v2 = vadd.f32 %v1290_v62, %v1153_v18  ;;  %v903_v10 = vmul.f32 %v826_v5, %v563_v1  ;;  %v1178_v61 = vpop.f32.mrf.mxu2 }
 0x144   :  { %1212 = vmatmul.bf16.gmra.mxu2 %v1730_v23 }
 0x145   :  { %v1371_v11 = vadd.f32 %v2276_v43, %v1291_v2 }
 0x147   :  { %v1403_v16 = vmax.f32 %v1371_v11, 0.0 }
 0x148   :  { %v475_v3 = vpop.f32.mrf.mxu0  ;;  %v564_v4 = vpop.f32.mrf.mxu1 }
 0x149   :  { %v565_v7 = vadd.f32 %v564_v4, %v475_v3 }
 0x14a   :  { %v1292_v8 = vpop.f32.mrf.mxu3 }
 0x14b   :  { %v904_v12 = vmul.f32 %v831_v6, %v565_v7  ;;  %v1293_v13 = vadd.f32 %v1292_v8, %v1155_v24  ;;  %v1180_v6 = vpop.f32.mrf.mxu2 }
 0x14d   :  { %v1372_v14 = vadd.f32 %v2276_v43, %v1293_v13  ;;  %v925_v15 = vpack.c.bf16 %v904_v12, %v903_v10  ;;  %v856_v12 = vpop.permute.xlu2 %855 }
 0x14f   :  { %v1404_v17 = vmax.f32 %v1372_v14, 0.0  ;;  %1334 = vmatmul.bf16.gmra.mxu3 %v925_v15  ;;  %v861_v14 = vpop.permute.xlu0 %860 }
 0x150   :  { %v478_v18 = vpop.f32.mrf.mxu0  ;;  %v567_v19 = vpop.f32.mrf.mxu1 }
 0x151   :  { %v1845_v20 = vpack.c.bf16 %v1404_v17, %v1403_v16  ;;  %v568_v24 = vadd.f32 %v567_v19, %v478_v18 }
 0x152   :  { %v1295_v21 = vpop.f32.mrf.mxu3 }
 0x153   :  { %1932 = vst [vmem:[%s2397_s7 + $0x8] sm:$0xff] %v1845_v20   ;;  %v1296_v25 = vadd.f32 %v1295_v21, %v2266_v32  ;;  %v905_v34 = vmul.f32 %v836_v28, %v568_v24 }
 0x155   :  { %v1373_v35 = vadd.f32 %v2276_v43, %v1296_v25 }
 0x157   :  { %v1405_v41 = vmax.f32 %v1373_v35, 0.0  ;;  %v871_v35 = vpop.permute.xlu2 %870 }
 0x158   :  { %v480_v26 = vpop.f32.mrf.mxu0  ;;  %v569_v27 = vpop.f32.mrf.mxu1 }
 0x159   :  { %v570_v30 = vadd.f32 %v569_v27, %v480_v26 }
 0x15a   :  { %v1297_v31 = vpop.f32.mrf.mxu3 }
 0x15b   :  { %v906_v36 = vmul.f32 %v841_v29, %v570_v30  ;;  %v1298_v37 = vadd.f32 %v1297_v31, %v2268_v39  ;;  %v1731_v39 = vld [vmem:[%s2395_s2 + $0x70] sm:$0xff] }
 0x15c   :  { %1217 = vmatmul.bf16.gmra.mxu2 %v1731_v39 }
 0x15d   :  { %v1374_v38 = vadd.f32 %v2276_v43, %v1298_v37  ;;  %v926_v40 = vpack.c.bf16 %v906_v36, %v905_v34  ;;  %v866_v34 = vpop.permute.xlu1 %865 }
 0x15f   :  { %v1406_v32 = vmax.f32 %v1374_v38, 0.0  ;;  %1339 = vmatmul.bf16.gmra.mxu3 %v926_v40 }
 0x160   :  { %v483_v42 = vpop.f32.mrf.mxu0  ;;  %v572_v44 = vpop.f32.mrf.mxu1 }
 0x161   :  { %v1850_v45 = vpack.c.bf16 %v1406_v32, %v1405_v41  ;;  %v573_v48 = vadd.f32 %v572_v44, %v483_v42 }
 0x162   :  { %v1300_v46 = vpop.f32.mrf.mxu3 }
 0x163   :  { %1933 = vst [vmem:[%s2397_s7 + $0x10] sm:$0xff] %v1850_v45   ;;  %v1301_v49 = vadd.f32 %v1300_v46, %v2278_v50  ;;  %v907_v57 = vmul.f32 %v846_v55, %v573_v48 }
 0x165   :  { %v1375_v58 = vadd.f32 %v2276_v43, %v1301_v49 }
 0x167   :  { %v1407_v1 = vmax.f32 %v1375_v58, 0.0  ;;  %v876_v58 = vpop.permute.xlu0 %875 }
 0x168   :  { %v485_v51 = vpop.f32.mrf.mxu0  ;;  %v574_v52 = vpop.f32.mrf.mxu1 }
 0x169   :  { %v575_v54 = vadd.f32 %v574_v52, %v485_v51 }
 0x16a   :  { %v1302_v56 = vpop.f32.mrf.mxu3 }
 0x16b   :  { %v908_v59 = vmul.f32 %v851_v53, %v575_v54  ;;  %v1303_v60 = vadd.f32 %v1302_v56, %v2282_v63  ;;  %v1732_v63 = vld [vmem:[%s2395_s2 + $0x78] sm:$0xff] }
 0x16c   :  { %1222 = vmatmul.bf16.gmra.mxu2 %v1732_v63 }
 0x16d   :  { %v1376_v62 = vadd.f32 %v2276_v43, %v1303_v60  ;;  %v927_v0 = vpack.c.bf16 %v908_v59, %v907_v57 }
 0x16f   :  { %v1408_v2 = vmax.f32 %v1376_v62, 0.0  ;;  %1344 = vmatmul.bf16.gmra.mxu3 %v927_v0 }
 0x170   :  { %v488_v50 = vpop.f32.mrf.mxu0  ;;  %v577_v3 = vpop.f32.mrf.mxu1 }
 0x171   :  { %v1855_v4 = vpack.c.bf16 %v1408_v2, %v1407_v1  ;;  %v578_v7 = vadd.f32 %v577_v3, %v488_v50 }
 0x172   :  { %v1305_v5 = vpop.f32.mrf.mxu3 }
 0x173   :  { %1934 = vst [vmem:[%s2397_s7 + $0x18] sm:$0xff] %v1855_v4   ;;  %v1306_v8 = vadd.f32 %v1305_v5, %v2290_v9  ;;  %v909_v16 = vmul.f32 %v856_v12, %v578_v7  ;;  %v1183_v9 = vpop.f32.mrf.mxu2 }
 0x175   :  { %v1377_v17 = vadd.f32 %v2276_v43, %v1306_v8 }
 0x177   :  { %v1409_v23 = vmax.f32 %v1377_v17, 0.0 }
 0x178   :  { %v490_v10 = vpop.f32.mrf.mxu0  ;;  %v579_v11 = vpop.f32.mrf.mxu1 }
 0x179   :  { %v580_v13 = vadd.f32 %v579_v11, %v490_v10 }
 0x17a   :  { %v1307_v15 = vpop.f32.mrf.mxu3 }
 0x17b   :  { %v910_v18 = vmul.f32 %v861_v14, %v580_v13  ;;  %v1308_v19 = vadd.f32 %v1307_v15, %v2294_v22  ;;  %v1185_v38 = vpop.f32.mrf.mxu2 }
 0x17d   :  { %v1378_v20 = vadd.f32 %v2276_v43, %v1308_v19  ;;  %v928_v21 = vpack.c.bf16 %v910_v18, %v909_v16 }
 0x17f   :  { %v1410_v24 = vmax.f32 %v1378_v20, 0.0  ;;  %1349 = vmatmul.bf16.gmra.mxu3 %v928_v21 }
 0x180   :  { %v493_v25 = vpop.f32.mrf.mxu0  ;;  %v582_v26 = vpop.f32.mrf.mxu1 }
 0x181   :  { %v1860_v27 = vpack.c.bf16 %v1410_v24, %v1409_v23  ;;  %v583_v29 = vadd.f32 %v582_v26, %v493_v25 }
 0x182   :  { %v1310_v28 = vpop.f32.mrf.mxu3 }
 0x183   :  { %1935 = vst [vmem:[%s2397_s7 + $0x20] sm:$0xff] %v1860_v27   ;;  %v1311_v30 = vadd.f32 %v1310_v28, %v2303_v33  ;;  %v911_v40 = vmul.f32 %v866_v34, %v583_v29  ;;  %v1188_v52 = vpop.f32.mrf.mxu2 }
 0x185   :  { %v1379_v41 = vadd.f32 %v2276_v43, %v1311_v30 }
 0x187   :  { %v1411_v46 = vmax.f32 %v1379_v41, 0.0 }
 0x188   :  { %v495_v31 = vpop.f32.mrf.mxu0  ;;  %v584_v22 = vpop.f32.mrf.mxu1 }
 0x189   :  { %v585_v36 = vadd.f32 %v584_v22, %v495_v31 }
 0x18a   :  { %v1312_v37 = vpop.f32.mrf.mxu3 }
 0x18b   :  { %v912_v32 = vmul.f32 %v871_v35, %v585_v36  ;;  %v1313_v42 = vadd.f32 %v1312_v37, %v2308_v47  ;;  %v881_v47 = vpop.permute.xlu1 %880  ;;  %v1190_v3 = vpop.f32.mrf.mxu2 }
 0x18d   :  { %v1380_v44 = vadd.f32 %v2276_v43, %v1313_v42  ;;  %v929_v45 = vpack.c.bf16 %v912_v32, %v911_v40 }
 0x18f   :  { %v1412_v39 = vmax.f32 %v1380_v44, 0.0  ;;  %1354 = vmatmul.bf16.gmra.mxu3 %v929_v45 }
 0x190   :  { %v498_v33 = vpop.f32.mrf.mxu0  ;;  %v587_v48 = vpop.f32.mrf.mxu1 }
 0x191   :  { %v1865_v49 = vpack.c.bf16 %v1412_v39, %v1411_v46  ;;  %v588_v53 = vadd.f32 %v587_v48, %v498_v33 }
 0x192   :  { %v1315_v51 = vpop.f32.mrf.mxu3 }
 0x193   :  { %1936 = vst [vmem:[%s2397_s7 + $0x28] sm:$0xff] %v1865_v49   ;;  %v1316_v54 = vadd.f32 %v1315_v51, %v1178_v61  ;;  %v913_v60 = vmul.f32 %v876_v58, %v588_v53  ;;  %v1193_v8 = vpop.f32.mrf.mxu2 }
 0x195   :  { %v1381_v62 = vadd.f32 %v2276_v43, %v1316_v54 }
 0x197   :  { %v1413_v4 = vmax.f32 %v1381_v62, 0.0 }
 0x198   :  { %v500_v55 = vpop.f32.mrf.mxu0  ;;  %v589_v56 = vpop.f32.mrf.mxu1 }
 0x199   :  { %v590_v57 = vadd.f32 %v589_v56, %v500_v55 }
 0x19a   :  { %v1317_v59 = vpop.f32.mrf.mxu3 }
 0x19b   :  { %v914_v0 = vmul.f32 %v881_v47, %v590_v57  ;;  %v1318_v1 = vadd.f32 %v1317_v59, %v1180_v6  ;;  %v1195_v17 = vpop.f32.mrf.mxu2 }
 0x19d   :  { %v1382_v2 = vadd.f32 %v2276_v43, %v1318_v1  ;;  %v930_v50 = vpack.c.bf16 %v914_v0, %v913_v60 }
 0x19f   :  { %v1414_v5 = vmax.f32 %v1382_v2, 0.0  ;;  %1359 = vmatmul.bf16.gmra.mxu3 %v930_v50 }
 0x1a1   :  { %v1870_v63 = vpack.c.bf16 %v1414_v5, %v1413_v4 }
 0x1a2   :  { %v1320_v61 = vpop.f32.mrf.mxu3 }
 0x1a3   :  { %1937 = vst [vmem:[%s2397_s7 + $0x30] sm:$0xff] %v1870_v63   ;;  %v1321_v7 = vadd.f32 %v1320_v61, %v1183_v9  ;;  %v1198_v23 = vpop.f32.mrf.mxu2 }
 0x1a5   :  { %v1383_v11 = vadd.f32 %v2276_v43, %v1321_v7 }
 0x1a7   :  { %v1415_v13 = vmax.f32 %v1383_v11, 0.0 }
 0x1aa   :  { %v1322_v10 = vpop.f32.mrf.mxu3 }
 0x1ab   :  { %v1323_v12 = vadd.f32 %v1322_v10, %v1185_v38  ;;  %v1200_v28 = vpop.f32.mrf.mxu2 }
 0x1ad   :  { %v1384_v6 = vadd.f32 %v2276_v43, %v1323_v12 }
 0x1af   :  { %v1416_v14 = vmax.f32 %v1384_v6, 0.0 }
 0x1b1   :  { %v1875_v15 = vpack.c.bf16 %v1416_v14, %v1415_v13 }
 0x1b2   :  { %v1325_v16 = vpop.f32.mrf.mxu3 }
 0x1b3   :  { %1938 = vst [vmem:[%s2397_s7 + $0x38] sm:$0xff] %v1875_v15   ;;  %v1326_v18 = vadd.f32 %v1325_v16, %v1188_v52  ;;  %v1203_v37 = vpop.f32.mrf.mxu2 }
 0x1b5   :  { %v1385_v20 = vadd.f32 %v2276_v43, %v1326_v18 }
 0x1b7   :  { %v1417_v9 = vmax.f32 %v1385_v20, 0.0 }
 0x1ba   :  { %v1327_v19 = vpop.f32.mrf.mxu3 }
 0x1bb   :  { %v1328_v21 = vadd.f32 %v1327_v19, %v1190_v3  ;;  %v1205_v42 = vpop.f32.mrf.mxu2 }
 0x1bd   :  { %v1386_v24 = vadd.f32 %v2276_v43, %v1328_v21 }
 0x1bf   :  { %v1418_v25 = vmax.f32 %v1386_v24, 0.0 }
 0x1c1   :  { %v1880_v26 = vpack.c.bf16 %v1418_v25, %v1417_v9 }
 0x1c2   :  { %v1330_v27 = vpop.f32.mrf.mxu3 }
 0x1c3   :  { %1939 = vst [vmem:[%s2397_s7 + $0x40] sm:$0xff] %v1880_v26   ;;  %v1331_v29 = vadd.f32 %v1330_v27, %v1193_v8  ;;  %v1208_v51 = vpop.f32.mrf.mxu2 }
 0x1c5   :  { %v1387_v31 = vadd.f32 %v2276_v43, %v1331_v29 }
 0x1c7   :  { %v1419_v35 = vmax.f32 %v1387_v31, 0.0 }
 0x1ca   :  { %v1332_v30 = vpop.f32.mrf.mxu3 }
 0x1cb   :  { %v1333_v22 = vadd.f32 %v1332_v30, %v1195_v17  ;;  %v1210_v47 = vpop.f32.mrf.mxu2 }
 0x1cd   :  { %v1388_v34 = vadd.f32 %v2276_v43, %v1333_v22 }
 0x1cf   :  { %v1420_v36 = vmax.f32 %v1388_v34, 0.0 }
 0x1d1   :  { %v1885_v38 = vpack.c.bf16 %v1420_v36, %v1419_v35 }
 0x1d2   :  { %v1335_v40 = vpop.f32.mrf.mxu3 }
 0x1d3   :  { %1940 = vst [vmem:[%s2397_s7 + $0x48] sm:$0xff] %v1885_v38   ;;  %v1336_v41 = vadd.f32 %v1335_v40, %v1198_v23  ;;  %v1213_v0 = vpop.f32.mrf.mxu2 }
 0x1d5   :  { %v1389_v44 = vadd.f32 %v2276_v43, %v1336_v41 }
 0x1d7   :  { %v1421_v39 = vmax.f32 %v1389_v44, 0.0 }
 0x1da   :  { %v1337_v32 = vpop.f32.mrf.mxu3 }
 0x1db   :  { %v1338_v45 = vadd.f32 %v1337_v32, %v1200_v28  ;;  %v1215_v61 = vpop.f32.mrf.mxu2 }
 0x1dd   :  { %v1390_v46 = vadd.f32 %v2276_v43, %v1338_v45 }
 0x1df   :  { %v1422_v33 = vmax.f32 %v1390_v46, 0.0 }
 0x1e1   :  { %v1890_v48 = vpack.c.bf16 %v1422_v33, %v1421_v39 }
 0x1e2   :  { %v1340_v49 = vpop.f32.mrf.mxu3 }
 0x1e3   :  { %1941 = vst [vmem:[%s2397_s7 + $0x50] sm:$0xff] %v1890_v48   ;;  %v1341_v52 = vadd.f32 %v1340_v49, %v1203_v37  ;;  %v1218_v6 = vpop.f32.mrf.mxu2 }
 0x1e5   :  { %v1391_v54 = vadd.f32 %v2276_v43, %v1341_v52 }
 0x1e7   :  { %v1423_v57 = vmax.f32 %v1391_v54, 0.0 }
 0x1ea   :  { %v1342_v53 = vpop.f32.mrf.mxu3 }
 0x1eb   :  { %v1343_v55 = vadd.f32 %v1342_v53, %v1205_v42  ;;  %v1220_v18 = vpop.f32.mrf.mxu2 }
 0x1ed   :  { %v1392_v56 = vadd.f32 %v2276_v43, %v1343_v55 }
 0x1ef   :  { %v1424_v58 = vmax.f32 %v1392_v56, 0.0 }
 0x1f1   :  { %v1895_v59 = vpack.c.bf16 %v1424_v58, %v1423_v57 }
 0x1f2   :  { %v1345_v60 = vpop.f32.mrf.mxu3 }
 0x1f3   :  { %1942 = vst [vmem:[%s2397_s7 + $0x58] sm:$0xff] %v1895_v59   ;;  %v1346_v62 = vadd.f32 %v1345_v60, %v1208_v51  ;;  %v1223_v26 = vpop.f32.mrf.mxu2 }
 0x1f5   :  { %v1393_v2 = vadd.f32 %v2276_v43, %v1346_v62 }
 0x1f7   :  { %v1425_v4 = vmax.f32 %v1393_v2, 0.0 }
 0x1fa   :  { %v1347_v1 = vpop.f32.mrf.mxu3 }
 0x1fb   :  { %v1348_v50 = vadd.f32 %v1347_v1, %v1210_v47  ;;  %v1225_v30 = vpop.f32.mrf.mxu2 }
 0x1fd   :  { %v1394_v3 = vadd.f32 %v2276_v43, %v1348_v50 }
 0x1ff   :  { %v1426_v5 = vmax.f32 %v1394_v3, 0.0 }
 0x201   :  { %v1900_v63 = vpack.c.bf16 %v1426_v5, %v1425_v4 }
 0x202   :  { %v1350_v7 = vpop.f32.mrf.mxu3 }
 0x203   :  { %1943 = vst [vmem:[%s2397_s7 + $0x60] sm:$0xff] %v1900_v63   ;;  %v1351_v8 = vadd.f32 %v1350_v7, %v1213_v0 }
 0x205   :  { %v1395_v11 = vadd.f32 %v2276_v43, %v1351_v8 }
 0x207   :  { %v1427_v14 = vmax.f32 %v1395_v11, 0.0 }
 0x20a   :  { %v1352_v10 = vpop.f32.mrf.mxu3 }
 0x20b   :  { %v1353_v12 = vadd.f32 %v1352_v10, %v1215_v61 }
 0x20d   :  { %v1396_v13 = vadd.f32 %v2276_v43, %v1353_v12 }
 0x20f   :  { %v1428_v15 = vmax.f32 %v1396_v13, 0.0 }
 0x211   :  { %v1905_v16 = vpack.c.bf16 %v1428_v15, %v1427_v14 }
 0x212   :  { %v1355_v17 = vpop.f32.mrf.mxu3 }
 0x213   :  { %1944 = vst [vmem:[%s2397_s7 + $0x68] sm:$0xff] %v1905_v16   ;;  %v1356_v19 = vadd.f32 %v1355_v17, %v1218_v6 }
 0x215   :  { %v1397_v21 = vadd.f32 %v2276_v43, %v1356_v19 }
 0x217   :  { %v1429_v9 = vmax.f32 %v1397_v21, 0.0 }
 0x21a   :  { %v1357_v20 = vpop.f32.mrf.mxu3 }
 0x21b   :  { %v1358_v23 = vadd.f32 %v1357_v20, %v1220_v18 }
 0x21d   :  { %v1398_v24 = vadd.f32 %v2276_v43, %v1358_v23 }
 0x21f   :  { %v1430_v25 = vmax.f32 %v1398_v24, 0.0 }
 0x221   :  { %v1910_v27 = vpack.c.bf16 %v1430_v25, %v1429_v9 }
 0x222   :  { %v1360_v28 = vpop.f32.mrf.mxu3 }
 0x223   :  { %1945 = vst [vmem:[%s2397_s7 + $0x70] sm:$0xff] %v1910_v27   ;;  %v1361_v29 = vadd.f32 %v1360_v28, %v1223_v26 }
 0x225   :  { %v1399_v22 = vadd.f32 %v2276_v43, %v1361_v29 }
 0x227   :  { %v1431_v36 = vmax.f32 %v1399_v22, 0.0 }
 0x22a   :  { %v1362_v31 = vpop.f32.mrf.mxu3 }
 0x22b   :  { %v1363_v34 = vadd.f32 %v1362_v31, %v1225_v30 }
 0x22d   :  { %v1400_v35 = vadd.f32 %v2276_v43, %v1363_v34 }
 0x22f   :  { %v1432_v37 = vmax.f32 %v1400_v35, 0.0 }
 0x231   :  { %v1915_v38 = vpack.c.bf16 %v1432_v37, %v1431_v36 }
 0x233   :  { %1946 = vst [vmem:[%s2397_s7 + $0x78] sm:$0xff] %v1915_v38  }

// kernel: sagenet_forward.3
= control target key start
LH: loop header
LB: loop body
LE: loop exit
PB: predicated region body
PF: predicated region fallthrough
CT: control target
= control target key end

     0   :  { %v2101_v1 = vmov 0   ;;  %s2796_s1 = inlined_call_operand.vmem [shape: bf16[256,128], index: 1, kind: input, shape index: {}, may-alias: {1,2}]   ;;  %s2797_s3 = inlined_call_operand.vmem [shape: f32[256,1], index: 3, kind: input, shape index: {}]   ;;  %s2798_s0 = inlined_call_operand.vmem [shape: s8[256,256], index: 0, kind: input, shape index: {}]   ;;  %s2799_s5 = inlined_call_operand.vmem [shape: bf16[128,128], index: 5, kind: input, shape index: {}]   ;;  %s2800_s4 = inlined_call_operand.vmem [shape: bf16[128,128], index: 4, kind: input, shape index: {}]   ;;  %s2801_s2 = inlined_call_operand.vmem [shape: bf16[256,128], index: 2, kind: input, shape index: {}, may-alias: {1,2}]   ;;  %s2802_s6 = inlined_call_operand.vmem [shape: f32[1,128], index: 6, kind: input, shape index: {}]   ;;  %s2803_s7 = inlined_call_operand.vmem [shape: bf16[128,128], index: 7, kind: input, shape index: {}]   ;;  %s2804_s8 = inlined_call_operand.vmem [shape: f32[1,128], index: 8, kind: input, shape index: {}]   ;;  %s2805_s9 = inlined_call_operand.vmem [shape: f32[256,128], index: 9, kind: output, shape index: {}]  }
   0x1   :  { %v1911_v0 = vld [vmem:[%s2796_s1 + $0x38] sm:$0xff]  ;;  %2096 = vset.pattern.permute.xlu0 %v2101_v1  ;;  %2097 = vset.pattern.permute.xlu1 %v2101_v1  ;;  %v1910_v2 = vld [vmem:[%s2796_s1 + $0x30] sm:$0xff]  ;;  %v697_v3 = vld [vmem:[%s2797_s3] sm:$0xff] }
   0x2   :  { %2098 = vset.pattern.permute.xlu2 %v2101_v1  ;;  %2071 = vmatpush.bf16.msra.mxu1 %v1911_v0  ;;  %v699_v4 = vld [vmem:[%s2797_s3 + $0x10] sm:$0xff]  ;;  %v1909_v5 = vld [vmem:[%s2796_s1 + $0x28] sm:$0xff]  ;;  %v1908_v7 = vld [vmem:[%s2796_s1 + $0x20] sm:$0xff] }
   0x3   :  { %420 = vmatpush.bf16.msra.mxu0 %v1911_v0  ;;  %731 = vperm.xlu0 %2096, %v697_v3   ;;  %v698_v6 = vld [vmem:[%s2797_s3 + $0x8] sm:$0xff]  ;;  %v1907_v8 = vld [vmem:[%s2796_s1 + $0x18] sm:$0xff]  ;;  %v703_v9 = vld [vmem:[%s2797_s3 + $0x30] sm:$0xff] }
   0x4   :  { %2072 = vmatpush.bf16.msra.mxu2 %v1911_v0  ;;  %2073 = vmatpush.bf16.msra.mxu3 %v1911_v0  ;;  %v700_v10 = vld [vmem:[%s2797_s3 + $0x18] sm:$0xff]  ;;  %v1906_v11 = vld [vmem:[%s2796_s1 + $0x10] sm:$0xff]  ;;  %v2188_v12 = vld [vmem:[%s2798_s0 + $0x20] sm:$0xff]  }
   0x5   :  { %741 = vperm.xlu1 %2097, %v699_v4   ;;  %v1986_v13 = vunpack.c.0.s8 %v2188_v12  ;;  %v1988_v14 = vunpack.c.2.s8 %v2188_v12  ;;  %v1905_v15 = vld [vmem:[%s2796_s1 + $0x8] sm:$0xff]  ;;  %v704_v16 = vld [vmem:[%s2797_s3 + $0x38] sm:$0xff]  ;;  %v1904_v20 = vld [vmem:[%s2796_s1] sm:$0xff] }
   0x6   :  { %2074 = vmatpush.bf16.msra.mxu1 %v1910_v2  ;;  %v706_v17 = vld [vmem:[%s2797_s3 + $0x48] sm:$0xff]  ;;  %v1919_v21 = vld [vmem:[%s2796_s1 + $0x78] sm:$0xff]  ;;  %v1918_v23 = vld [vmem:[%s2796_s1 + $0x70] sm:$0xff] }
   0x7   :  { %421 = vmatpush.bf16.msra.mxu0 %v1910_v2  ;;  %v212_v18 = vcvt.s32.f32 %v1986_v13  ;;  %v214_v19 = vcvt.s32.f32 %v1988_v14  ;;  %v709_v24 = vld [vmem:[%s2797_s3 + $0x60] sm:$0xff]  ;;  %v707_v25 = vld [vmem:[%s2797_s3 + $0x50] sm:$0xff]  ;;  %v2219_v26 = vld [vmem:[%s2798_s0 + $0x28] sm:$0xff]  }
   0x8   :  { %2075 = vmatpush.bf16.msra.mxu2 %v1910_v2  ;;  %2076 = vmatpush.bf16.msra.mxu3 %v1910_v2  ;;  %v1917_v27 = vld [vmem:[%s2796_s1 + $0x68] sm:$0xff]  ;;  %v1992_v28 = vunpack.c.0.s8 %v2219_v26  ;;  %v1994_v29 = vunpack.c.2.s8 %v2219_v26  ;;  %v1916_v30 = vld [vmem:[%s2796_s1 + $0x60] sm:$0xff]  ;;  %v712_v32 = vld [vmem:[%s2797_s3 + $0x78] sm:$0xff] }
   0x9   :  { %v268_v22 = vpack.c.bf16 %v214_v19, %v212_v18  ;;  %v710_v31 = vld [vmem:[%s2797_s3 + $0x68] sm:$0xff]  ;;  %v1915_v35 = vld [vmem:[%s2796_s1 + $0x58] sm:$0xff]  ;;  %v1914_v37 = vld [vmem:[%s2796_s1 + $0x50] sm:$0xff] }
   0xa   :  { %2077 = vmatpush.bf16.msra.mxu1 %v1909_v5  ;;  %v216_v33 = vcvt.s32.f32 %v1992_v28  ;;  %v218_v34 = vcvt.s32.f32 %v1994_v29  ;;  %v715_v38 = vld [vmem:[%s2797_s3 + $0x90] sm:$0xff]  ;;  %v713_v39 = vld [vmem:[%s2797_s3 + $0x80] sm:$0xff]  ;;  %v1913_v43 = vld [vmem:[%s2796_s1 + $0x48] sm:$0xff] }
   0xb   :  { %422 = vmatpush.bf16.msra.mxu0 %v1909_v5  ;;  %736 = vperm.xlu0 %2096, %v698_v6   ;;  %v2250_v40 = vld [vmem:[%s2798_s0 + $0x30] sm:$0xff]   ;;  %v2255_v41 = vld [vmem:[%s2798_s0] sm:$0xff]   ;;  %v716_v52 = vld [vmem:[%s2797_s3 + $0x98] sm:$0xff] }
   0xc   :  { %2078 = vmatpush.bf16.msra.mxu2 %v1909_v5  ;;  %2079 = vmatpush.bf16.msra.mxu3 %v1909_v5  ;;  %v270_v36 = vpack.c.bf16 %v218_v34, %v216_v33  ;;  %v701_v42 = vld [vmem:[%s2797_s3 + $0x20] sm:$0xff]  ;;  %v1962_v44 = vunpack.c.0.s8 %v2255_v41  ;;  %v1964_v45 = vunpack.c.2.s8 %v2255_v41  ;;  %v1998_v46 = vunpack.c.0.s8 %v2250_v40  ;;  %v718_v53 = vld [vmem:[%s2797_s3 + $0xa8] sm:$0xff]  ;;  %v719_v59 = vld [vmem:[%s2797_s3 + $0xb0] sm:$0xff] }
   0xd   :  { %746 = vperm.xlu1 %2097, %v700_v10   ;;  %751 = vperm.xlu2 %2098, %v701_v42   ;;  %v2000_v47 = vunpack.c.2.s8 %v2250_v40  ;;  %v1912_v51 = vld [vmem:[%s2796_s1 + $0x40] sm:$0xff]  ;;  %v702_v58 = vld [vmem:[%s2797_s3 + $0x28] sm:$0xff]  ;;  %v2288_v60 = vld [vmem:[%s2798_s0 + $0x38] sm:$0xff]  }
   0xe   :  { %2080 = vmatpush.bf16.msra.mxu1 %v1908_v7  ;;  %v196_v48 = vcvt.s32.f32 %v1962_v44  ;;  %v198_v49 = vcvt.s32.f32 %v1964_v45  ;;  %v220_v54 = vcvt.s32.f32 %v1998_v46  ;;  %v721_v57 = vld [vmem:[%s2797_s3 + $0xc0] sm:$0xff]  ;;  %v2056_v61 = vld [vmem:[%s2798_s0 + $0x8] sm:$0xff]   ;;  %v2004_v0 = vunpack.c.0.s8 %v2288_v60  ;;  %v708_v13 = vld [vmem:[%s2797_s3 + $0x58] sm:$0xff] }
   0xf   :  { %423 = vmatpush.bf16.msra.mxu0 %v1908_v7  ;;  %v222_v55 = vcvt.s32.f32 %v2000_v47  ;;  %v1968_v62 = vunpack.c.0.s8 %v2056_v61  ;;  %v1970_v63 = vunpack.c.2.s8 %v2056_v61  ;;  %v2006_v1 = vunpack.c.2.s8 %v2288_v60  ;;  %v705_v5 = vld [vmem:[%s2797_s3 + $0x40] sm:$0xff]  ;;  %v722_v6 = vld [vmem:[%s2797_s3 + $0xc8] sm:$0xff]  ;;  %v723_v46 = vld [vmem:[%s2797_s3 + $0xd0] sm:$0xff] }
  0x10   :  { %2081 = vmatpush.bf16.msra.mxu2 %v1908_v7  ;;  %2082 = vmatpush.bf16.msra.mxu3 %v1908_v7  ;;  %v260_v50 = vpack.c.bf16 %v198_v49, %v196_v48  ;;  %v724_v7 = vld [vmem:[%s2797_s3 + $0xd8] sm:$0xff]  ;;  %v725_v14 = vld [vmem:[%s2797_s3 + $0xe0] sm:$0xff]  ;;  %v714_v29 = vld [vmem:[%s2797_s3 + $0x88] sm:$0xff] }
  0x11   :  { %v272_v56 = vpack.c.bf16 %v222_v55, %v220_v54  ;;  %v200_v2 = vcvt.s32.f32 %v1968_v62  ;;  %v202_v3 = vcvt.s32.f32 %v1970_v63 }
  0x12   :  { %2083 = vmatpush.bf16.msra.mxu1 %v1907_v8 }
  0x13   :  { %761 = vperm.xlu0 %2096, %v703_v9   ;;  %424 = vmatpush.bf16.msra.mxu0 %v1907_v8  ;;  %v262_v4 = vpack.c.bf16 %v202_v3, %v200_v2  ;;  %v226_v9 = vcvt.s32.f32 %v2006_v1  ;;  %v1951_v2 = vld [vmem:[%s2799_s5 + $0x38] sm:$0xff] }
  0x14   :  { %2084 = vmatpush.bf16.msra.mxu2 %v1907_v8  ;;  %2085 = vmatpush.bf16.msra.mxu3 %v1907_v8  ;;  %v224_v8 = vcvt.s32.f32 %v2004_v0  ;;  %v1927_v3 = vld [vmem:[%s2800_s4 + $0x38] sm:$0xff] }
  0x15   :  { %766 = vperm.xlu1 %2097, %v704_v16   ;;  %756 = vperm.xlu2 %2098, %v702_v58  }
  0x16   :  { %2086 = vmatpush.bf16.msra.mxu1 %v1906_v11  ;;  %v274_v10 = vpack.c.bf16 %v226_v9, %v224_v8  ;;  %v2370_v8 = vld [vmem:[%s2798_s0 + $0x68] sm:$0xff]  }
  0x17   :  { %425 = vmatpush.bf16.msra.mxu0 %v1906_v11 }
  0x18   :  { %2087 = vmatpush.bf16.msra.mxu2 %v1906_v11  ;;  %2088 = vmatpush.bf16.msra.mxu3 %v1906_v11  ;;  %v727_v11 = vld [vmem:[%s2797_s3 + $0xf0] sm:$0xff] }
  0x1a   :  { %2089 = vmatpush.bf16.msra.mxu1 %v1905_v15 }
  0x1b   :  { %776 = vperm.xlu0 %2096, %v706_v17   ;;  %426 = vmatpush.bf16.msra.mxu0 %v1905_v15 }
  0x1c   :  { %2090 = vmatpush.bf16.msra.mxu2 %v1905_v15  ;;  %2091 = vmatpush.bf16.msra.mxu3 %v1905_v15  ;;  %v2057_v15 = vld [vmem:[%s2798_s0 + $0x10] sm:$0xff]  }
  0x1d   :  { %781 = vperm.xlu1 %2097, %v707_v25   ;;  %771 = vperm.xlu2 %2098, %v705_v5   ;;  %v1974_v16 = vunpack.c.0.s8 %v2057_v15  ;;  %v1976_v17 = vunpack.c.2.s8 %v2057_v15  ;;  %v1975_v44 = vunpack.c.1.s8 %v2057_v15  ;;  %v1977_v45 = vunpack.c.3.s8 %v2057_v15 }
  0x1e   :  { %2092 = vmatpush.bf16.msra.mxu1 %v1904_v20 }
  0x1f   :  { %427 = vmatpush.bf16.msra.mxu0 %v1904_v20  ;;  %v204_v18 = vcvt.s32.f32 %v1974_v16  ;;  %v206_v19 = vcvt.s32.f32 %v1976_v17  ;;  %v205_v47 = vcvt.s32.f32 %v1975_v44  ;;  %v207_v48 = vcvt.s32.f32 %v1977_v45  ;;  %v1950_v17 = vld [vmem:[%s2799_s5 + $0x30] sm:$0xff] }
  0x20   :  { %2093 = vmatpush.bf16.msra.mxu2 %v1904_v20  ;;  %2094 = vmatpush.bf16.msra.mxu3 %v1904_v20  ;;  %v1963_v20 = vunpack.c.1.s8 %v2255_v41  ;;  %v1993_v45 = vunpack.c.1.s8 %v2219_v26 }
  0x21   :  { %448 = vmatmul.bf16.vlgmr.msra.gmra.mxu1 %v268_v22  ;;  %v264_v22 = vpack.c.bf16 %v206_v19, %v204_v18  ;;  %v265_v49 = vpack.c.bf16 %v207_v48, %v205_v47  ;;  %v1926_v18 = vld [vmem:[%s2800_s4 + $0x30] sm:$0xff]  ;;  %v1947_v48 = vld [vmem:[%s2799_s5 + $0x18] sm:$0xff] }
  0x22   :  { %509 = vmatpush.bf16.msrb.mxu1 %v1919_v21  ;;  %428 = vmatmul.bf16.vlgmr.msra.gmra.mxu0 %v260_v50  ;;  %v1965_v21 = vunpack.c.3.s8 %v2255_v41  ;;  %v197_v25 = vcvt.s32.f32 %v1963_v20  ;;  %v2342_v50 = vld [vmem:[%s2798_s0 + $0x40] sm:$0xff]  }
  0x23   :  { %791 = vperm.xlu0 %2096, %v709_v24   ;;  %v728_v24 = vld [vmem:[%s2797_s3 + $0xf8] sm:$0xff] }
  0x24   :  { %1145 = vmatpush.bf16.msrb.mxu2 %v1951_v2  ;;  %1282 = vmatpush.bf16.msrb.mxu3 %v1927_v3  ;;  %v1922_v2 = vld [vmem:[%s2800_s4 + $0x10] sm:$0xff] }
  0x25   :  { %796 = vperm.xlu1 %2097, %v710_v31   ;;  %786 = vperm.xlu2 %2098, %v708_v13   ;;  %v2042_v13 = vunpack.c.2.s8 %v2370_v8 }
  0x26   :  { %510 = vmatpush.bf16.msrb.mxu1 %v1918_v23  ;;  %v711_v23 = vld [vmem:[%s2797_s3 + $0x70] sm:$0xff] }
  0x27   :  { %v250_v19 = vcvt.s32.f32 %v2042_v13  ;;  %v1921_v13 = vld [vmem:[%s2800_s4 + $0x8] sm:$0xff] }
  0x28   :  { %1146 = vmatpush.bf16.msrb.mxu2 %v1950_v17  ;;  %1283 = vmatpush.bf16.msrb.mxu3 %v1926_v18  ;;  %v1928_v18 = vld [vmem:[%s2801_s2] sm:$0xff] }
  0x2a   :  { %511 = vmatpush.bf16.msrb.mxu1 %v1917_v27  ;;  %v199_v27 = vcvt.s32.f32 %v1965_v21 }
  0x2b   :  { %806 = vperm.xlu0 %2096, %v712_v32  }
  0x2c   :  { %v261_v28 = vpack.c.bf16 %v199_v27, %v197_v25  ;;  %v1925_v25 = vld [vmem:[%s2800_s4 + $0x28] sm:$0xff] }
  0x2d   :  { %811 = vperm.xlu1 %2097, %v713_v39   ;;  %801 = vperm.xlu2 %2098, %v711_v23   ;;  %v1989_v23 = vunpack.c.3.s8 %v2188_v12 }
  0x2e   :  { %512 = vmatpush.bf16.msrb.mxu1 %v1916_v30  ;;  %v2058_v30 = vld [vmem:[%s2798_s0 + $0x18] sm:$0xff]   ;;  %1284 = vmatpush.bf16.msrb.mxu3 %v1925_v25 }
  0x2f   :  { %v1980_v31 = vunpack.c.0.s8 %v2058_v30  ;;  %v1982_v32 = vunpack.c.2.s8 %v2058_v30  ;;  %v1981_v0 = vunpack.c.1.s8 %v2058_v30  ;;  %v1983_v1 = vunpack.c.3.s8 %v2058_v30 }
  0x31   :  { %453 = vmatmul.bf16.gmra.mxu1 %v270_v36  ;;  %v208_v33 = vcvt.s32.f32 %v1980_v31  ;;  %v210_v34 = vcvt.s32.f32 %v1982_v32  ;;  %v1971_v36 = vunpack.c.3.s8 %v2056_v61  ;;  %v211_v5 = vcvt.s32.f32 %v1983_v1  ;;  %v2400_v31 = vld [vmem:[%s2798_s0 + $0x70] sm:$0xff]  }
  0x32   :  { %513 = vmatpush.bf16.msrb.mxu1 %v1915_v35  ;;  %433 = vmatmul.bf16.gmra.mxu0 %v262_v4  ;;  %v1969_v35 = vunpack.c.1.s8 %v2056_v61  ;;  %v209_v4 = vcvt.s32.f32 %v1981_v0  ;;  %v1946_v1 = vld [vmem:[%s2799_s5 + $0x10] sm:$0xff] }
  0x33   :  { %821 = vperm.xlu0 %2096, %v715_v38   ;;  %v717_v38 = vld [vmem:[%s2797_s3 + $0xa0] sm:$0xff]  ;;  %v203_v41 = vcvt.s32.f32 %v1971_v36 }
  0x34   :  { %v201_v39 = vcvt.s32.f32 %v1969_v35  ;;  %v2048_v35 = vunpack.c.2.s8 %v2400_v31 }
  0x35   :  { %826 = vperm.xlu1 %2097, %v716_v52   ;;  %816 = vperm.xlu2 %2098, %v714_v29   ;;  %v2010_v52 = vunpack.c.0.s8 %v2342_v50 }
  0x36   :  { %514 = vmatpush.bf16.msrb.mxu1 %v1914_v37  ;;  %v266_v37 = vpack.c.bf16 %v210_v34, %v208_v33  ;;  %v263_v42 = vpack.c.bf16 %v203_v41, %v201_v39  ;;  %v2046_v34 = vunpack.c.0.s8 %v2400_v31  ;;  %v1948_v39 = vld [vmem:[%s2799_s5 + $0x20] sm:$0xff] }
  0x37   :  { %v1924_v41 = vld [vmem:[%s2800_s4 + $0x20] sm:$0xff] }
  0x38   :  { %1285 = vmatpush.bf16.msrb.mxu3 %v1924_v41  ;;  %v1930_v41 = vld [vmem:[%s2801_s2 + $0x10] sm:$0xff] }
  0x3a   :  { %515 = vmatpush.bf16.msrb.mxu1 %v1913_v43  ;;  %v720_v43 = vld [vmem:[%s2797_s3 + $0xb8] sm:$0xff] }
  0x3b   :  { %836 = vperm.xlu0 %2096, %v718_v53   ;;  %v2012_v53 = vunpack.c.2.s8 %v2342_v50 }
  0x3d   :  { %841 = vperm.xlu1 %2097, %v719_v59   ;;  %831 = vperm.xlu2 %2098, %v717_v38   ;;  %v726_v59 = vld [vmem:[%s2797_s3 + $0xe8] sm:$0xff]  ;;  %v252_v38 = vcvt.s32.f32 %v2046_v34 }
  0x3e   :  { %516 = vmatpush.bf16.msrb.mxu1 %v1912_v51  ;;  %v2347_v51 = vld [vmem:[%s2798_s0 + $0x60] sm:$0xff]  }
  0x3f   :  { %v2034_v54 = vunpack.c.0.s8 %v2347_v51  ;;  %v2036_v55 = vunpack.c.2.s8 %v2347_v51 }
  0x41   :  { %458 = vmatmul.bf16.gmra.mxu1 %v272_v56  ;;  %v228_v56 = vcvt.s32.f32 %v2010_v52  ;;  %v244_v58 = vcvt.s32.f32 %v2034_v54  ;;  %v246_v61 = vcvt.s32.f32 %v2036_v55  ;;  %v217_v52 = vcvt.s32.f32 %v1993_v45 }
  0x42   :  { %438 = vmatmul.bf16.gmra.mxu0 %v264_v22  ;;  %v1987_v22 = vunpack.c.1.s8 %v2188_v12  ;;  %v2395_v12 = vld [vmem:[%s2798_s0 + $0x50] sm:$0xff]  }
  0x43   :  { %851 = vperm.xlu0 %2096, %v721_v57   ;;  %v230_v57 = vcvt.s32.f32 %v2012_v53  ;;  %v284_v63 = vpack.c.bf16 %v246_v61, %v244_v58  ;;  %v2022_v32 = vunpack.c.0.s8 %v2395_v12  ;;  %v2024_v33 = vunpack.c.2.s8 %v2395_v12 }
  0x44   :  { %v213_v27 = vcvt.s32.f32 %v1987_v22 }
  0x45   :  { %856 = vperm.xlu1 %2097, %v722_v6   ;;  %846 = vperm.xlu2 %2098, %v720_v43   ;;  %v276_v62 = vpack.c.bf16 %v230_v57, %v228_v56  ;;  %v267_v6 = vpack.c.bf16 %v211_v5, %v209_v4  ;;  %v236_v36 = vcvt.s32.f32 %v2022_v32  ;;  %v2432_v56 = vld [vmem:[%s2798_s0 + $0x78] sm:$0xff]   ;;  %v2011_v32 = vunpack.c.1.s8 %v2342_v50 }
  0x46   :  { %488 = vmatmul.bf16.vlgmr.msra.gmra.mxu3 %v284_v63  ;;  %v2054_v61 = vunpack.c.2.s8 %v2432_v56 }
  0x47   :  { %468 = vmatmul.bf16.vlgmr.msra.gmra.mxu2 %v276_v62  ;;  %v229_v34 = vcvt.s32.f32 %v2011_v32 }
  0x48   :  { %v258_v3 = vcvt.s32.f32 %v2054_v61 }
  0x4b   :  { %866 = vperm.xlu0 %2096, %v724_v7   ;;  %v2365_v7 = vld [vmem:[%s2798_s0 + $0x48] sm:$0xff]  }
  0x4c   :  { %v2016_v9 = vunpack.c.0.s8 %v2365_v7 }
  0x4d   :  { %871 = vperm.xlu1 %2097, %v725_v14   ;;  %861 = vperm.xlu2 %2098, %v723_v46   ;;  %v1995_v46 = vunpack.c.3.s8 %v2219_v26  ;;  %v2427_v26 = vld [vmem:[%s2798_s0 + $0x58] sm:$0xff]  }
  0x4e   :  { %v232_v14 = vcvt.s32.f32 %v2016_v9  ;;  %v2028_v57 = vunpack.c.0.s8 %v2427_v26  ;;  %v2030_v58 = vunpack.c.2.s8 %v2427_v26  ;;  %v2001_v9 = vunpack.c.3.s8 %v2250_v40 }
  0x4f   :  { %v219_v53 = vcvt.s32.f32 %v1995_v46 }
  0x50   :  { %v240_v62 = vcvt.s32.f32 %v2028_v57  ;;  %v242_v63 = vcvt.s32.f32 %v2030_v58 }
  0x51   :  { %463 = vmatmul.bf16.gmra.mxu1 %v274_v10  ;;  %v2018_v10 = vunpack.c.2.s8 %v2365_v7  ;;  %v271_v54 = vpack.c.bf16 %v219_v53, %v217_v52 }
  0x52   :  { %443 = vmatmul.bf16.gmra.mxu0 %v266_v37  ;;  %v238_v37 = vcvt.s32.f32 %v2024_v33  ;;  %v282_v4 = vpack.c.bf16 %v242_v63, %v240_v62  ;;  %v2013_v33 = vunpack.c.3.s8 %v2342_v50  ;;  %v2019_v50 = vunpack.c.3.s8 %v2365_v7  ;;  %v1931_v63 = vld [vmem:[%s2801_s2 + $0x18] sm:$0xff] }
  0x53   :  { %881 = vperm.xlu0 %2096, %v727_v11   ;;  %v2040_v11 = vunpack.c.0.s8 %v2370_v8  ;;  %v234_v15 = vcvt.s32.f32 %v2018_v10 }
  0x54   :  { %v280_v43 = vpack.c.bf16 %v238_v37, %v236_v36 }
  0x55   :  { %886 = vperm.xlu1 %2097, %v728_v24   ;;  %876 = vperm.xlu2 %2098, %v726_v59   ;;  %v248_v16 = vcvt.s32.f32 %v2040_v11  ;;  %v278_v20 = vpack.c.bf16 %v234_v15, %v232_v14  ;;  %v1949_v24 = vld [vmem:[%s2799_s5 + $0x28] sm:$0xff]  ;;  %v2052_v59 = vunpack.c.0.s8 %v2432_v56  ;;  %v223_v15 = vcvt.s32.f32 %v2001_v9 }
  0x56   :  { %1147 = vmatpush.bf16.msrb.mxu2 %v1949_v24  ;;  %v1945_v11 = vld [vmem:[%s2799_s5 + $0x8] sm:$0xff] }
  0x57   :  { %v286_v21 = vpack.c.bf16 %v250_v19, %v248_v16  ;;  %473 = vmatmul.bf16.gmra.mxu2 %v278_v20  ;;  %v256_v0 = vcvt.s32.f32 %v2052_v59  ;;  %v1920_v19 = vld [vmem:[%s2800_s4] sm:$0xff]  ;;  %v2005_v20 = vunpack.c.1.s8 %v2288_v60 }
  0x59   :  { %493 = vmatmul.bf16.gmra.mxu3 %v286_v21  ;;  %v290_v5 = vpack.c.bf16 %v258_v3, %v256_v0  ;;  %v2007_v21 = vunpack.c.3.s8 %v2288_v60  ;;  %v2023_v0 = vunpack.c.1.s8 %v2395_v12 }
  0x5a   :  { %1148 = vmatpush.bf16.msrb.mxu2 %v1948_v39 }
  0x5b   :  { %v227_v24 = vcvt.s32.f32 %v2007_v21  ;;  %v2031_v21 = vunpack.c.3.s8 %v2427_v26 }
  0x5e   :  { %1149 = vmatpush.bf16.msrb.mxu2 %v1947_v48 }
  0x61   :  { %517 = vmatmul.bf16.vlgmr.msrb.gmra.mxu1 %v261_v28  ;;  %v215_v28 = vcvt.s32.f32 %v1989_v23  ;;  %v225_v23 = vcvt.s32.f32 %v2005_v20  ;;  %v2029_v20 = vunpack.c.1.s8 %v2427_v26  ;;  %v1933_v26 = vld [vmem:[%s2801_s2 + $0x28] sm:$0xff] }
  0x62   :  { %1150 = vmatpush.bf16.msrb.mxu2 %v1946_v1  ;;  %v2025_v1 = vunpack.c.3.s8 %v2395_v12 }
  0x63   :  { %v269_v29 = vpack.c.bf16 %v215_v28, %v213_v27  ;;  %v275_v25 = vpack.c.bf16 %v227_v24, %v225_v23 }
  0x66   :  { %1151 = vmatpush.bf16.msrb.mxu2 %v1945_v11  ;;  %v237_v11 = vcvt.s32.f32 %v2023_v0 }
  0x67   :  { %478 = vmatmul.bf16.gmra.mxu2 %v280_v43 }
  0x71   :  { %522 = vmatmul.bf16.gmra.mxu1 %v263_v42  ;;  %v254_v42 = vcvt.s32.f32 %v2048_v35  ;;  %v231_v35 = vcvt.s32.f32 %v2013_v33  ;;  %v241_v33 = vcvt.s32.f32 %v2029_v20 }
  0x73   :  { %v288_v44 = vpack.c.bf16 %v254_v42, %v252_v38  ;;  %v277_v37 = vpack.c.bf16 %v231_v35, %v229_v34  ;;  %v243_v34 = vcvt.s32.f32 %v2031_v21  ;;  %v2047_v21 = vunpack.c.1.s8 %v2400_v31 }
  0x75   :  { %498 = vmatmul.bf16.gmra.mxu3 %v288_v44  ;;  %v732_v38 = vpop.permute.xlu0 %731  ;;  %v2017_v44 = vunpack.c.1.s8 %v2365_v7 }
  0x77   :  { %483 = vmatmul.bf16.gmra.mxu2 %v282_v4  ;;  %v233_v53 = vcvt.s32.f32 %v2017_v44  ;;  %v742_v58 = vpop.permute.xlu1 %741 }
  0x7d   :  { %v737_v48 = vpop.permute.xlu0 %736 }
  0x7f   :  { %v747_v4 = vpop.permute.xlu1 %746 }
  0x81   :  { %527 = vmatmul.bf16.gmra.mxu1 %v265_v49  ;;  %v1923_v49 = vld [vmem:[%s2800_s4 + $0x18] sm:$0xff] }
  0x82   :  { %1286 = vmatpush.bf16.msrb.mxu3 %v1923_v49 }
  0x85   :  { %503 = vmatmul.bf16.gmra.mxu3 %v290_v5 }
  0x86   :  { %1287 = vmatpush.bf16.msrb.mxu3 %v1922_v2 }
  0x8a   :  { %1288 = vmatpush.bf16.msrb.mxu3 %v1921_v13  ;;  %v239_v13 = vcvt.s32.f32 %v2025_v1  ;;  %v2041_v1 = vunpack.c.1.s8 %v2370_v8 }
  0x8e   :  { %1289 = vmatpush.bf16.msrb.mxu3 %v1920_v19 }
  0x91   :  { %532 = vmatmul.bf16.gmra.mxu1 %v267_v6  ;;  %v1999_v6 = vunpack.c.1.s8 %v2250_v40  ;;  %v1944_v40 = vld [vmem:[%s2799_s5] sm:$0xff] }
  0x92   :  { %1152 = vmatpush.bf16.msrb.mxu2 %v1944_v40 }
  0x93   :  { %v221_v14 = vcvt.s32.f32 %v1999_v6 }
  0x95   :  { %v273_v16 = vpack.c.bf16 %v223_v15, %v221_v14  ;;  %1153 = vmatmul.bf16.vlgmr.msrb.gmra.mxu2 %v1928_v18  ;;  %v281_v15 = vpack.c.bf16 %v239_v13, %v237_v11  ;;  %v1932_v18 = vld [vmem:[%s2801_s2 + $0x20] sm:$0xff] }
  0x9e   :  { %v2390_v30 = vpop.f32.mrf.mxu1 }
  0x9f   :  { %v429_v28 = vpop.f32.mrf.mxu0 }
  0xa1   :  { %537 = vmatmul.bf16.gmra.mxu1 %v269_v29  ;;  %v1929_v29 = vld [vmem:[%s2801_s2 + $0x8] sm:$0xff] }
  0xa5   :  { %1158 = vmatmul.bf16.gmra.mxu2 %v1929_v29 }
  0xa6   :  { %v2414_v47 = vpop.f32.mrf.mxu1 }
  0xa7   :  { %v431_v36 = vpop.f32.mrf.mxu0 }
  0xae   :  { %v2422_v55 = vpop.f32.mrf.mxu1 }
  0xaf   :  { %v434_v42 = vpop.f32.mrf.mxu0 }
  0xb1   :  { %542 = vmatmul.bf16.gmra.mxu1 %v271_v54  ;;  %v235_v54 = vcvt.s32.f32 %v2019_v50 }
  0xb3   :  { %v279_v59 = vpack.c.bf16 %v235_v54, %v233_v53 }
  0xb5   :  { %1163 = vmatmul.bf16.gmra.mxu2 %v1930_v41 }
  0xb6   :  { %v2446_v10 = vpop.f32.mrf.mxu1 }
  0xb7   :  { %v436_v61 = vpop.f32.mrf.mxu0 }
  0xbe   :  { %v2454_v17 = vpop.f32.mrf.mxu1 }
  0xbf   :  { %v439_v5 = vpop.f32.mrf.mxu0 }
  0xc1   :  { %547 = vmatmul.bf16.gmra.mxu1 %v273_v16  ;;  %v752_v16 = vpop.permute.xlu2 %751 }
  0xc5   :  { %1168 = vmatmul.bf16.gmra.mxu2 %v1931_v63  ;;  %v1934_v63 = vld [vmem:[%s2801_s2 + $0x30] sm:$0xff] }
  0xc6   :  { %v2467_v22 = vpop.f32.mrf.mxu1 }
  0xc7   :  { %v441_v12 = vpop.f32.mrf.mxu0 }
  0xce   :  { %v2469_v27 = vpop.f32.mrf.mxu1 }
  0xd1   :  { %552 = vmatmul.bf16.gmra.mxu1 %v275_v25  ;;  %v757_v25 = vpop.permute.xlu2 %756 }
  0xd5   :  { %1173 = vmatmul.bf16.gmra.mxu2 %v1932_v18 }
  0xd6   :  { %v2476_v60 = vpop.f32.mrf.mxu1 }
  0xde   :  { %v518_v39 = vpop.f32.mrf.mxu1 }
  0xdf   :  { %v519_v43 = vadd.f32 %v518_v39, %v429_v28  ;;  %v2493_v28 = vpop.f32.mrf.mxu2 }
  0xe1   :  { %557 = vmatmul.bf16.gmra.mxu1 %v277_v37  ;;  %v889_v49 = vmul.f32 %v732_v38, %v519_v43  ;;  %v283_v37 = vpack.c.bf16 %v243_v34, %v241_v33  ;;  %v2037_v43 = vunpack.c.3.s8 %v2347_v51 }
  0xe5   :  { %1178 = vmatmul.bf16.gmra.mxu2 %v1933_v26 }
  0xe6   :  { %v520_v45 = vpop.f32.mrf.mxu1 }
  0xe7   :  { %v521_v46 = vadd.f32 %v520_v45, %v431_v36  ;;  %v444_v36 = vpop.f32.mrf.mxu0  ;;  %v2495_v39 = vpop.f32.mrf.mxu2 }
  0xe8   :  { %v762_v45 = vpop.permute.xlu0 %761 }
  0xe9   :  { %v890_v52 = vmul.f32 %v737_v48, %v521_v46  ;;  %v767_v48 = vpop.permute.xlu1 %766 }
  0xeb   :  { %v921_v57 = vpack.c.bf16 %v890_v52, %v889_v49 }
  0xed   :  { %1290 = vmatmul.bf16.vlgmr.msrb.gmra.mxu3 %v921_v57  ;;  %v247_v57 = vcvt.s32.f32 %v2037_v43 }
  0xee   :  { %v523_v62 = vpop.f32.mrf.mxu1 }
  0xef   :  { %v524_v7 = vadd.f32 %v523_v62, %v434_v42  ;;  %v2035_v42 = vunpack.c.1.s8 %v2347_v51  ;;  %v446_v44 = vpop.f32.mrf.mxu0  ;;  %v2502_v49 = vpop.f32.mrf.mxu2  ;;  %v1959_v51 = vld [vmem:[%s2803_s7 + $0x38] sm:$0xff] }
  0xf0   :  { %1523 = vmatpush.bf16.msrb.mxu0 %v1959_v51 }
  0xf1   :  { %562 = vmatmul.bf16.gmra.mxu1 %v279_v59  ;;  %v891_v6 = vmul.f32 %v742_v58, %v524_v7  ;;  %v245_v54 = vcvt.s32.f32 %v2035_v42  ;;  %v2512_v7 = vpop.f32.mrf.mxu3 }
  0xf3   :  { %v285_v59 = vpack.c.bf16 %v247_v57, %v245_v54 }
  0xf5   :  { %1183 = vmatmul.bf16.gmra.mxu2 %v1934_v63  ;;  %v1954_v63 = vld [vmem:[%s2803_s7 + $0x10] sm:$0xff] }
  0xf6   :  { %v525_v2 = vpop.f32.mrf.mxu1 }
  0xf7   :  { %v526_v3 = vadd.f32 %v525_v2, %v436_v61  ;;  %v2504_v62 = vpop.f32.mrf.mxu2  ;;  %v2043_v2 = vunpack.c.3.s8 %v2370_v8 }
  0xf9   :  { %v892_v9 = vmul.f32 %v747_v4, %v526_v3  ;;  %v777_v4 = vpop.permute.xlu0 %776 }
  0xfb   :  { %v922_v14 = vpack.c.bf16 %v892_v9, %v891_v6  ;;  %v772_v6 = vpop.permute.xlu2 %771 }
  0xfd   :  { %1295 = vmatmul.bf16.gmra.mxu3 %v922_v14  ;;  %v249_v14 = vcvt.s32.f32 %v2041_v1 }
  0xfe   :  { %v528_v40 = vpop.f32.mrf.mxu1 }
  0xff   :  { %v529_v19 = vadd.f32 %v528_v40, %v439_v5  ;;  %v2518_v9 = vpop.f32.mrf.mxu2  ;;  %v2523_v40 = vpop.f32.mrf.mxu3 }
 0x101   :  { %567 = vmatmul.bf16.gmra.mxu1 %v281_v15  ;;  %v893_v29 = vmul.f32 %v752_v16, %v529_v19  ;;  %v251_v15 = vcvt.s32.f32 %v2043_v2  ;;  %v1935_v19 = vld [vmem:[%s2801_s2 + $0x38] sm:$0xff] }
 0x103   :  { %v287_v8 = vpack.c.bf16 %v251_v15, %v249_v14  ;;  %v787_v33 = vpop.permute.xlu2 %786 }
 0x105   :  { %1188 = vmatmul.bf16.gmra.mxu2 %v1935_v19 }
 0x106   :  { %v530_v23 = vpop.f32.mrf.mxu1 }
 0x107   :  { %v531_v24 = vadd.f32 %v530_v23, %v441_v12  ;;  %v2525_v12 = vpop.f32.mrf.mxu2  ;;  %v2049_v23 = vunpack.c.3.s8 %v2400_v31 }
 0x109   :  { %v894_v32 = vmul.f32 %v757_v25, %v531_v24  ;;  %v2536_v25 = vpop.f32.mrf.mxu3 }
 0x10b   :  { %v923_v35 = vpack.c.bf16 %v894_v32, %v893_v29  ;;  %v782_v29 = vpop.permute.xlu1 %781  ;;  %v802_v14 = vpop.permute.xlu2 %801 }
 0x10d   :  { %1300 = vmatmul.bf16.gmra.mxu3 %v923_v35 }
 0x10e   :  { %v533_v38 = vpop.f32.mrf.mxu1 }
 0x10f   :  { %v534_v41 = vadd.f32 %v533_v38, %v444_v36  ;;  %v2539_v34 = vpop.f32.mrf.mxu2  ;;  %v255_v38 = vcvt.s32.f32 %v2049_v23 }
 0x111   :  { %572 = vmatmul.bf16.gmra.mxu1 %v283_v37  ;;  %v895_v52 = vmul.f32 %v762_v45, %v534_v41  ;;  %v253_v37 = vcvt.s32.f32 %v2047_v21  ;;  %v2544_v42 = vpop.f32.mrf.mxu3  ;;  %v2053_v45 = vunpack.c.1.s8 %v2432_v56 }
 0x113   :  { %v289_v31 = vpack.c.bf16 %v255_v38, %v253_v37  ;;  %v797_v54 = vpop.permute.xlu1 %796 }
 0x116   :  { %v535_v50 = vpop.f32.mrf.mxu1 }
 0x117   :  { %v536_v46 = vadd.f32 %v535_v50, %v446_v44  ;;  %v2546_v43 = vpop.f32.mrf.mxu2  ;;  %v1936_v44 = vld [vmem:[%s2801_s2 + $0x40] sm:$0xff] }
 0x118   :  { %1193 = vmatmul.bf16.gmra.mxu2 %v1936_v44 }
 0x119   :  { %v896_v53 = vmul.f32 %v767_v48, %v536_v46  ;;  %v2055_v46 = vunpack.c.3.s8 %v2432_v56 }
 0x11b   :  { %v924_v58 = vpack.c.bf16 %v896_v53, %v895_v52  ;;  %v792_v52 = vpop.permute.xlu0 %791  ;;  %v259_v51 = vcvt.s32.f32 %v2055_v46  ;;  %v812_v23 = vpop.permute.xlu1 %811 }
 0x11d   :  { %1305 = vmatmul.bf16.gmra.mxu3 %v924_v58 }
 0x11e   :  { %v538_v61 = vpop.f32.mrf.mxu1 }
 0x11f   :  { %v539_v0 = vadd.f32 %v538_v61, %v2390_v30  ;;  %v1958_v30 = vld [vmem:[%s2803_s7 + $0x30] sm:$0xff]  ;;  %v1154_v57 = vpop.f32.mrf.mxu2  ;;  %v257_v61 = vcvt.s32.f32 %v2053_v45 }
 0x120   :  { %1524 = vmatpush.bf16.msrb.mxu0 %v1958_v30 }
 0x121   :  { %577 = vmatmul.bf16.gmra.mxu1 %v285_v59  ;;  %v897_v11 = vmul.f32 %v772_v6, %v539_v0  ;;  %v291_v56 = vpack.c.bf16 %v259_v51, %v257_v61 }
 0x126   :  { %v540_v3 = vpop.f32.mrf.mxu1 }
 0x127   :  { %v541_v5 = vadd.f32 %v540_v3, %v2414_v47  ;;  %v1957_v47 = vld [vmem:[%s2803_s7 + $0x28] sm:$0xff]  ;;  %v1156_v2 = vpop.f32.mrf.mxu2 }
 0x128   :  { %1525 = vmatpush.bf16.msrb.mxu0 %v1957_v47 }
 0x129   :  { %v898_v13 = vmul.f32 %v777_v4, %v541_v5  ;;  %v1953_v5 = vld [vmem:[%s2803_s7 + $0x8] sm:$0xff] }
 0x12b   :  { %v925_v16 = vpack.c.bf16 %v898_v13, %v897_v11  ;;  %v807_v11 = vpop.permute.xlu0 %806 }
 0x12d   :  { %1310 = vmatmul.bf16.gmra.mxu3 %v925_v16 }
 0x12e   :  { %v543_v18 = vpop.f32.mrf.mxu1 }
 0x12f   :  { %v544_v20 = vadd.f32 %v543_v18, %v2422_v55  ;;  %v1956_v55 = vld [vmem:[%s2803_s7 + $0x20] sm:$0xff]  ;;  %v1159_v15 = vpop.f32.mrf.mxu2 }
 0x130   :  { %1526 = vmatpush.bf16.msrb.mxu0 %v1956_v55  ;;  %v1952_v18 = vld [vmem:[%s2803_s7] sm:$0xff] }
 0x131   :  { %582 = vmatmul.bf16.gmra.mxu1 %v287_v8  ;;  %v899_v35 = vmul.f32 %v782_v29, %v544_v20 }
 0x133   :  { %v822_v44 = vpop.permute.xlu0 %821 }
 0x136   :  { %v545_v24 = vpop.f32.mrf.mxu1 }
 0x137   :  { %v546_v32 = vadd.f32 %v545_v24, %v2446_v10  ;;  %v1955_v10 = vld [vmem:[%s2803_s7 + $0x18] sm:$0xff]  ;;  %v1161_v19 = vpop.f32.mrf.mxu2  ;;  %v817_v24 = vpop.permute.xlu2 %816 }
 0x138   :  { %1527 = vmatpush.bf16.msrb.mxu0 %v1955_v10 }
 0x139   :  { %v900_v36 = vmul.f32 %v787_v33, %v546_v32 }
 0x13b   :  { %v926_v26 = vpack.c.bf16 %v900_v36, %v899_v35 }
 0x13c   :  { %1528 = vmatpush.bf16.msrb.mxu0 %v1954_v63 }
 0x13d   :  { %1315 = vmatmul.bf16.gmra.mxu3 %v926_v26 }
 0x13e   :  { %v548_v41 = vpop.f32.mrf.mxu1 }
 0x13f   :  { %v549_v50 = vadd.f32 %v548_v41, %v2454_v17  ;;  %v2561_v17 = vpop.f32.mrf.mxu3  ;;  %v1164_v33 = vpop.f32.mrf.mxu2 }
 0x140   :  { %1529 = vmatpush.bf16.msrb.mxu0 %v1953_v5  ;;  %v832_v5 = vpop.permute.xlu2 %831 }
 0x141   :  { %587 = vmatmul.bf16.gmra.mxu1 %v289_v31  ;;  %v901_v58 = vmul.f32 %v792_v52, %v549_v50  ;;  %v827_v50 = vpop.permute.xlu1 %826 }
 0x144   :  { %1530 = vmatpush.bf16.msrb.mxu0 %v1952_v18 }
 0x146   :  { %v550_v48 = vpop.f32.mrf.mxu1 }
 0x147   :  { %v551_v53 = vadd.f32 %v550_v48, %v2467_v22  ;;  %v1937_v22 = vld [vmem:[%s2801_s2 + $0x48] sm:$0xff]  ;;  %v2566_v3 = vpop.f32.mrf.mxu3  ;;  %v2585_v26 = vpop.f32.mrf.mxu2 }
 0x148   :  { %1198 = vmatmul.bf16.gmra.mxu2 %v1937_v22 }
 0x149   :  { %v902_v59 = vmul.f32 %v797_v54, %v551_v53 }
 0x14b   :  { %v927_v0 = vpack.c.bf16 %v902_v59, %v901_v58 }
 0x14d   :  { %1320 = vmatmul.bf16.gmra.mxu3 %v927_v0 }
 0x14e   :  { %v553_v1 = vpop.f32.mrf.mxu1 }
 0x14f   :  { %v554_v4 = vadd.f32 %v553_v1, %v2469_v27  ;;  %v2576_v27 = vpop.f32.mrf.mxu3  ;;  %v2597_v48 = vpop.f32.mrf.mxu2 }
 0x151   :  { %592 = vmatmul.bf16.gmra.mxu1 %v291_v56  ;;  %v903_v30 = vmul.f32 %v802_v14, %v554_v4  ;;  %v837_v4 = vpop.permute.xlu0 %836 }
 0x156   :  { %v555_v6 = vpop.f32.mrf.mxu1 }
 0x157   :  { %v556_v13 = vadd.f32 %v555_v6, %v2476_v60  ;;  %v1938_v60 = vld [vmem:[%s2801_s2 + $0x50] sm:$0xff]  ;;  %v2583_v32 = vpop.f32.mrf.mxu3  ;;  %v1171_v56 = vpop.f32.mrf.mxu2 }
 0x158   :  { %1203 = vmatmul.bf16.gmra.mxu2 %v1938_v60 }
 0x159   :  { %v904_v16 = vmul.f32 %v807_v11, %v556_v13 }
 0x15b   :  { %v928_v8 = vpack.c.bf16 %v904_v16, %v903_v30 }
 0x15d   :  { %1325 = vmatmul.bf16.gmra.mxu3 %v928_v8 }
 0x15e   :  { %v558_v47 = vpop.f32.mrf.mxu1 }
 0x15f   :  { %v559_v20 = vadd.f32 %v558_v47, %v2493_v28  ;;  %v1939_v28 = vld [vmem:[%s2801_s2 + $0x58] sm:$0xff]  ;;  %v2606_v13 = vpop.f32.mrf.mxu2 }
 0x161   :  { %v905_v35 = vmul.f32 %v812_v23, %v559_v20 }
 0x166   :  { %v560_v21 = vpop.f32.mrf.mxu1 }
 0x167   :  { %v561_v29 = vadd.f32 %v560_v21, %v2495_v39  ;;  %v2594_v39 = vld [vmem:[%s2802_s6] ss:$0 sm:$0xff]  ;;  %v1176_v23 = vpop.f32.mrf.mxu2 }
 0x168   :  { %1208 = vmatmul.bf16.gmra.mxu2 %v1939_v28 }
 0x169   :  { %v906_v36 = vmul.f32 %v817_v24, %v561_v29 }
 0x16b   :  { %v929_v37 = vpack.c.bf16 %v906_v36, %v905_v35  ;;  %v842_v35 = vpop.permute.xlu1 %841  ;;  %v847_v36 = vpop.permute.xlu2 %846 }
 0x16d   :  { %1330 = vmatmul.bf16.gmra.mxu3 %v929_v37 }
 0x16e   :  { %v563_v38 = vpop.f32.mrf.mxu1 }
 0x16f   :  { %v564_v31 = vadd.f32 %v563_v38, %v2502_v49 }
 0x170   :  { %v1291_v55 = vpop.f32.mrf.mxu3 }
 0x171   :  { %v1292_v41 = vadd.f32 %v1291_v55, %v1154_v57  ;;  %v907_v52 = vmul.f32 %v822_v44, %v564_v31  ;;  %v2615_v55 = vpop.f32.mrf.mxu2 }
 0x173   :  { %v1375_v53 = vadd.f32 %v2594_v39, %v1292_v41 }
 0x175   :  { %v1407_v59 = vmax.f32 %v1375_v53, 0.0 }
 0x176   :  { %v565_v10 = vpop.f32.mrf.mxu1 }
 0x177   :  { %v566_v45 = vadd.f32 %v565_v10, %v2504_v62  ;;  %v1940_v62 = vld [vmem:[%s2801_s2 + $0x60] sm:$0xff] }
 0x178   :  { %v1293_v46 = vpop.f32.mrf.mxu3  ;;  %1213 = vmatmul.bf16.gmra.mxu2 %v1940_v62 }
 0x179   :  { %v908_v54 = vmul.f32 %v827_v50, %v566_v45  ;;  %v1294_v49 = vadd.f32 %v1293_v46, %v1156_v2  ;;  %v1181_v53 = vpop.f32.mrf.mxu2 }
 0x17b   :  { %v1376_v57 = vadd.f32 %v2594_v39, %v1294_v49  ;;  %v930_v58 = vpack.c.bf16 %v908_v54, %v907_v52 }
 0x17d   :  { %v1408_v61 = vmax.f32 %v1376_v57, 0.0  ;;  %1335 = vmatmul.bf16.gmra.mxu3 %v930_v58  ;;  %v852_v57 = vpop.permute.xlu0 %851 }
 0x17e   :  { %v568_v51 = vpop.f32.mrf.mxu1 }
 0x17f   :  { %v1439_v63 = vpack.c.bf16 %v1408_v61, %v1407_v59  ;;  %v569_v1 = vadd.f32 %v568_v51, %v2518_v9  ;;  %v857_v59 = vpop.permute.xlu1 %856 }
 0x180   :  { %v1296_v0 = vpop.f32.mrf.mxu3 }
 0x181   :  { %1531 = vmatmul.bf16.vlgmr.msrb.gmra.mxu0 %v1439_v63  ;;  %v1297_v22 = vadd.f32 %v1296_v0, %v1159_v15  ;;  %v909_v14 = vmul.f32 %v832_v5, %v569_v1  ;;  %v1184_v1 = vpop.f32.mrf.mxu2 }
 0x183   :  { %v1377_v30 = vadd.f32 %v2594_v39, %v1297_v22 }
 0x185   :  { %v1409_v60 = vmax.f32 %v1377_v30, 0.0 }
 0x186   :  { %v570_v2 = vpop.f32.mrf.mxu1 }
 0x187   :  { %v571_v6 = vadd.f32 %v570_v2, %v2525_v12  ;;  %v1941_v12 = vld [vmem:[%s2801_s2 + $0x68] sm:$0xff] }
 0x188   :  { %v1298_v11 = vpop.f32.mrf.mxu3  ;;  %1218 = vmatmul.bf16.gmra.mxu2 %v1941_v12 }
 0x189   :  { %v910_v16 = vmul.f32 %v837_v4, %v571_v6  ;;  %v1299_v8 = vadd.f32 %v1298_v11, %v1161_v19  ;;  %v1186_v11 = vpop.f32.mrf.mxu2 }
 0x18b   :  { %v1378_v18 = vadd.f32 %v2594_v39, %v1299_v8  ;;  %v931_v47 = vpack.c.bf16 %v910_v16, %v909_v14  ;;  %v867_v16 = vpop.permute.xlu0 %866 }
 0x18d   :  { %1340 = vmatmul.bf16.gmra.mxu3 %v931_v47  ;;  %v1410_v9 = vmax.f32 %v1378_v18, 0.0  ;;  %v862_v18 = vpop.permute.xlu2 %861 }
 0x18e   :  { %v573_v15 = vpop.f32.mrf.mxu1 }
 0x18f   :  { %v1440_v20 = vpack.c.bf16 %v1410_v9, %v1409_v60  ;;  %v574_v24 = vadd.f32 %v573_v15, %v2539_v34 }
 0x190   :  { %v1301_v21 = vpop.f32.mrf.mxu3 }
 0x191   :  { %1536 = vmatmul.bf16.gmra.mxu0 %v1440_v20  ;;  %v1302_v29 = vadd.f32 %v1301_v21, %v1164_v33  ;;  %v911_v28 = vmul.f32 %v842_v35, %v574_v24 }
 0x193   :  { %v1379_v31 = vadd.f32 %v2594_v39, %v1302_v29 }
 0x195   :  { %v1411_v34 = vmax.f32 %v1379_v31, 0.0 }
 0x196   :  { %v575_v19 = vpop.f32.mrf.mxu1 }
 0x197   :  { %v576_v37 = vadd.f32 %v575_v19, %v2546_v43  ;;  %v1942_v43 = vld [vmem:[%s2801_s2 + $0x70] sm:$0xff] }
 0x198   :  { %v1303_v38 = vpop.f32.mrf.mxu3  ;;  %1223 = vmatmul.bf16.gmra.mxu2 %v1942_v43 }
 0x199   :  { %v912_v41 = vmul.f32 %v847_v36, %v576_v37  ;;  %v1304_v10 = vadd.f32 %v1303_v38, %v2585_v26  ;;  %v872_v38 = vpop.permute.xlu1 %871 }
 0x19b   :  { %v1380_v44 = vadd.f32 %v2594_v39, %v1304_v10  ;;  %v932_v50 = vpack.c.bf16 %v912_v41, %v911_v28  ;;  %v877_v28 = vpop.permute.xlu2 %876 }
 0x19d   :  { %1345 = vmatmul.bf16.gmra.mxu3 %v932_v50  ;;  %v1412_v33 = vmax.f32 %v1380_v44, 0.0 }
 0x19e   :  { %v578_v45 = vpop.f32.mrf.mxu1 }
 0x19f   :  { %v1441_v46 = vpack.c.bf16 %v1412_v33, %v1411_v34  ;;  %v579_v54 = vadd.f32 %v578_v45, %v2512_v7 }
 0x1a0   :  { %v1306_v52 = vpop.f32.mrf.mxu3 }
 0x1a1   :  { %1541 = vmatmul.bf16.gmra.mxu0 %v1441_v46  ;;  %v1307_v49 = vadd.f32 %v1306_v52, %v2597_v48  ;;  %v913_v51 = vmul.f32 %v852_v57, %v579_v54  ;;  %v882_v57 = vpop.permute.xlu0 %881 }
 0x1a3   :  { %v1381_v63 = vadd.f32 %v2594_v39, %v1307_v49 }
 0x1a5   :  { %v1413_v4 = vmax.f32 %v1381_v63, 0.0 }
 0x1a6   :  { %v580_v26 = vpop.f32.mrf.mxu1 }
 0x1a7   :  { %v581_v58 = vadd.f32 %v580_v26, %v2523_v40  ;;  %v1943_v40 = vld [vmem:[%s2801_s2 + $0x78] sm:$0xff] }
 0x1a8   :  { %v1308_v61 = vpop.f32.mrf.mxu3  ;;  %1228 = vmatmul.bf16.gmra.mxu2 %v1943_v40 }
 0x1a9   :  { %v914_v0 = vmul.f32 %v857_v59, %v581_v58  ;;  %v1309_v62 = vadd.f32 %v1308_v61, %v1171_v56  ;;  %v887_v59 = vpop.permute.xlu1 %886 }
 0x1ab   :  { %v1382_v22 = vadd.f32 %v2594_v39, %v1309_v62  ;;  %v933_v2 = vpack.c.bf16 %v914_v0, %v913_v51 }
 0x1ad   :  { %1350 = vmatmul.bf16.gmra.mxu3 %v933_v2  ;;  %v1414_v7 = vmax.f32 %v1382_v22, 0.0 }
 0x1ae   :  { %v583_v48 = vpop.f32.mrf.mxu1 }
 0x1af   :  { %v1442_v5 = vpack.c.bf16 %v1414_v7, %v1413_v4  ;;  %v584_v14 = vadd.f32 %v583_v48, %v2536_v25 }
 0x1b0   :  { %v1311_v6 = vpop.f32.mrf.mxu3 }
 0x1b1   :  { %1546 = vmatmul.bf16.gmra.mxu0 %v1442_v5  ;;  %v1312_v56 = vadd.f32 %v1311_v6, %v2606_v13  ;;  %v915_v60 = vmul.f32 %v862_v18, %v584_v14  ;;  %v1189_v13 = vpop.f32.mrf.mxu2 }
 0x1b3   :  { %v1383_v9 = vadd.f32 %v2594_v39, %v1312_v56 }
 0x1b5   :  { %v1415_v24 = vmax.f32 %v1383_v9, 0.0 }
 0x1b6   :  { %v585_v30 = vpop.f32.mrf.mxu1 }
 0x1b7   :  { %v586_v8 = vadd.f32 %v585_v30, %v2544_v42 }
 0x1b8   :  { %v1313_v47 = vpop.f32.mrf.mxu3 }
 0x1b9   :  { %v916_v15 = vmul.f32 %v867_v16, %v586_v8  ;;  %v1314_v20 = vadd.f32 %v1313_v47, %v1176_v23  ;;  %v1191_v41 = vpop.f32.mrf.mxu2 }
 0x1bb   :  { %v1384_v21 = vadd.f32 %v2594_v39, %v1314_v20  ;;  %v934_v12 = vpack.c.bf16 %v916_v15, %v915_v60 }
 0x1bd   :  { %v1416_v29 = vmax.f32 %v1384_v21, 0.0  ;;  %1355 = vmatmul.bf16.gmra.mxu3 %v934_v12  ;;  %v2652_v21 = vld [vmem:[%s2804_s8] ss:$0 sm:$0xff] }
 0x1be   :  { %v588_v25 = vpop.f32.mrf.mxu1 }
 0x1bf   :  { %v1443_v19 = vpack.c.bf16 %v1416_v29, %v1415_v24  ;;  %v589_v42 = vadd.f32 %v588_v25, %v2561_v17 }
 0x1c0   :  { %v1316_v35 = vpop.f32.mrf.mxu3 }
 0x1c1   :  { %1551 = vmatmul.bf16.gmra.mxu0 %v1443_v19  ;;  %v1317_v36 = vadd.f32 %v1316_v35, %v2615_v55  ;;  %v917_v10 = vmul.f32 %v872_v38, %v589_v42  ;;  %v1194_v54 = vpop.f32.mrf.mxu2 }
 0x1c3   :  { %v1385_v44 = vadd.f32 %v2594_v39, %v1317_v36 }
 0x1c5   :  { %v1417_v46 = vmax.f32 %v1385_v44, 0.0 }
 0x1c6   :  { %v590_v37 = vpop.f32.mrf.mxu1 }
 0x1c7   :  { %v591_v23 = vadd.f32 %v590_v37, %v2566_v3 }
 0x1c8   :  { %v1318_v31 = vpop.f32.mrf.mxu3 }
 0x1c9   :  { %v918_v50 = vmul.f32 %v877_v28, %v591_v23  ;;  %v1319_v34 = vadd.f32 %v1318_v31, %v1181_v53  ;;  %v1196_v2 = vpop.f32.mrf.mxu2 }
 0x1cb   :  { %v1386_v33 = vadd.f32 %v2594_v39, %v1319_v34  ;;  %v935_v45 = vpack.c.bf16 %v918_v50, %v917_v10 }
 0x1cd   :  { %v1418_v52 = vmax.f32 %v1386_v33, 0.0  ;;  %1360 = vmatmul.bf16.gmra.mxu3 %v935_v45 }
 0x1ce   :  { %v593_v17 = vpop.f32.mrf.mxu1 }
 0x1cf   :  { %v1444_v55 = vpack.c.bf16 %v1418_v52, %v1417_v46  ;;  %v594_v3 = vadd.f32 %v593_v17, %v2576_v27 }
 0x1d0   :  { %v1321_v43 = vpop.f32.mrf.mxu3 }
 0x1d1   :  { %1556 = vmatmul.bf16.gmra.mxu0 %v1444_v55  ;;  %v1322_v49 = vadd.f32 %v1321_v43, %v1184_v1  ;;  %v919_v61 = vmul.f32 %v882_v57, %v594_v3  ;;  %v1199_v5 = vpop.f32.mrf.mxu2 }
 0x1d3   :  { %v1387_v51 = vadd.f32 %v2594_v39, %v1322_v49 }
 0x1d5   :  { %v1419_v4 = vmax.f32 %v1387_v51, 0.0 }
 0x1d6   :  { %v595_v26 = vpop.f32.mrf.mxu1 }
 0x1d7   :  { %v596_v58 = vadd.f32 %v595_v26, %v2583_v32 }
 0x1d8   :  { %v1323_v53 = vpop.f32.mrf.mxu3 }
 0x1d9   :  { %v920_v63 = vmul.f32 %v887_v59, %v596_v58  ;;  %v1324_v0 = vadd.f32 %v1323_v53, %v1186_v11  ;;  %v1201_v8 = vpop.f32.mrf.mxu2 }
 0x1db   :  { %v1388_v62 = vadd.f32 %v2594_v39, %v1324_v0  ;;  %v936_v22 = vpack.c.bf16 %v920_v63, %v919_v61 }
 0x1dd   :  { %v1420_v7 = vmax.f32 %v1388_v62, 0.0  ;;  %1365 = vmatmul.bf16.gmra.mxu3 %v936_v22 }
 0x1df   :  { %v1445_v27 = vpack.c.bf16 %v1420_v7, %v1419_v4 }
 0x1e0   :  { %v1326_v1 = vpop.f32.mrf.mxu3 }
 0x1e1   :  { %1561 = vmatmul.bf16.gmra.mxu0 %v1445_v27  ;;  %v1327_v48 = vadd.f32 %v1326_v1, %v1189_v13  ;;  %v1204_v15 = vpop.f32.mrf.mxu2 }
 0x1e3   :  { %v1389_v6 = vadd.f32 %v2594_v39, %v1327_v48 }
 0x1e5   :  { %v1421_v56 = vmax.f32 %v1389_v6, 0.0 }
 0x1e8   :  { %v1328_v32 = vpop.f32.mrf.mxu3 }
 0x1e9   :  { %v1329_v40 = vadd.f32 %v1328_v32, %v1191_v41  ;;  %v1206_v42 = vpop.f32.mrf.mxu2 }
 0x1eb   :  { %v1390_v14 = vadd.f32 %v2594_v39, %v1329_v40 }
 0x1ed   :  { %v1422_v11 = vmax.f32 %v1390_v14, 0.0 }
 0x1ef   :  { %v1446_v30 = vpack.c.bf16 %v1422_v11, %v1421_v56 }
 0x1f0   :  { %v1331_v16 = vpop.f32.mrf.mxu3 }
 0x1f1   :  { %1566 = vmatmul.bf16.gmra.mxu0 %v1446_v30  ;;  %v1332_v18 = vadd.f32 %v1331_v16, %v1194_v54  ;;  %v1209_v33 = vpop.f32.mrf.mxu2 }
 0x1f3   :  { %v1391_v60 = vadd.f32 %v2594_v39, %v1332_v18 }
 0x1f5   :  { %v1423_v12 = vmax.f32 %v1391_v60, 0.0 }
 0x1f8   :  { %v1333_v47 = vpop.f32.mrf.mxu3 }
 0x1f9   :  { %v1334_v9 = vadd.f32 %v1333_v47, %v1196_v2  ;;  %v1211_v49 = vpop.f32.mrf.mxu2 }
 0x1fb   :  { %v1392_v20 = vadd.f32 %v2594_v39, %v1334_v9 }
 0x1fd   :  { %v1424_v24 = vmax.f32 %v1392_v20, 0.0 }
 0x1fe   :  { %v1532_v29 = vpop.f32.mrf.mxu0 }
 0x1ff   :  { %v1533_v25 = vadd.f32 %v2652_v21, %v1532_v29  ;;  %v1447_v13 = vpack.c.bf16 %v1424_v24, %v1423_v12 }
 0x200   :  { %v1336_v19 = vpop.f32.mrf.mxu3 }
 0x201   :  { %v1612_v35 = vmax.f32 %v1533_v25, 0.0  ;;  %1571 = vmatmul.bf16.gmra.mxu0 %v1447_v13  ;;  %v1337_v36 = vadd.f32 %v1336_v19, %v1199_v5  ;;  %v1214_v2 = vpop.f32.mrf.mxu2 }
 0x203   :  { %1644 = vst [vmem:[%s2805_s9] sm:$0xff] %v1612_v35  ;;  %v1393_v23 = vadd.f32 %v2594_v39, %v1337_v36 }
 0x205   :  { %v1425_v44 = vmax.f32 %v1393_v23, 0.0 }
 0x206   :  { %v1534_v37 = vpop.f32.mrf.mxu0 }
 0x207   :  { %v1535_v38 = vadd.f32 %v2652_v21, %v1534_v37 }
 0x208   :  { %v1338_v28 = vpop.f32.mrf.mxu3 }
 0x209   :  { %v1613_v31 = vmax.f32 %v1535_v38, 0.0  ;;  %v1339_v41 = vadd.f32 %v1338_v28, %v1201_v8  ;;  %v1216_v40 = vpop.f32.mrf.mxu2 }
 0x20b   :  { %1645 = vst [vmem:[%s2805_s9 + $0x8] sm:$0xff] %v1613_v31  ;;  %v1394_v10 = vadd.f32 %v2594_v39, %v1339_v41 }
 0x20d   :  { %v1426_v50 = vmax.f32 %v1394_v10, 0.0 }
 0x20e   :  { %v1537_v34 = vpop.f32.mrf.mxu0 }
 0x20f   :  { %v1538_v45 = vadd.f32 %v2652_v21, %v1537_v34  ;;  %v1448_v46 = vpack.c.bf16 %v1426_v50, %v1425_v44 }
 0x210   :  { %v1341_v52 = vpop.f32.mrf.mxu3 }
 0x211   :  { %v1614_v17 = vmax.f32 %v1538_v45, 0.0  ;;  %1576 = vmatmul.bf16.gmra.mxu0 %v1448_v46  ;;  %v1342_v55 = vadd.f32 %v1341_v52, %v1204_v15  ;;  %v1219_v9 = vpop.f32.mrf.mxu2 }
 0x213   :  { %1646 = vst [vmem:[%s2805_s9 + $0x10] sm:$0xff] %v1614_v17  ;;  %v1395_v26 = vadd.f32 %v2594_v39, %v1342_v55 }
 0x215   :  { %v1427_v53 = vmax.f32 %v1395_v26, 0.0 }
 0x216   :  { %v1539_v43 = vpop.f32.mrf.mxu0 }
 0x217   :  { %v1540_v54 = vadd.f32 %v2652_v21, %v1539_v43 }
 0x218   :  { %v1343_v3 = vpop.f32.mrf.mxu3 }
 0x219   :  { %v1615_v57 = vmax.f32 %v1540_v54, 0.0  ;;  %v1344_v58 = vadd.f32 %v1343_v3, %v1206_v42  ;;  %v1221_v37 = vpop.f32.mrf.mxu2 }
 0x21b   :  { %1647 = vst [vmem:[%s2805_s9 + $0x18] sm:$0xff] %v1615_v57  ;;  %v1396_v59 = vadd.f32 %v2594_v39, %v1344_v58 }
 0x21d   :  { %v1428_v61 = vmax.f32 %v1396_v59, 0.0 }
 0x21e   :  { %v1542_v51 = vpop.f32.mrf.mxu0 }
 0x21f   :  { %v1543_v63 = vadd.f32 %v2652_v21, %v1542_v51  ;;  %v1449_v0 = vpack.c.bf16 %v1428_v61, %v1427_v53 }
 0x220   :  { %v1346_v62 = vpop.f32.mrf.mxu3 }
 0x221   :  { %v1616_v22 = vmax.f32 %v1543_v63, 0.0  ;;  %1581 = vmatmul.bf16.gmra.mxu0 %v1449_v0  ;;  %v1347_v4 = vadd.f32 %v1346_v62, %v1209_v33  ;;  %v1224_v33 = vpop.f32.mrf.mxu2 }
 0x223   :  { %1648 = vst [vmem:[%s2805_s9 + $0x20] sm:$0xff] %v1616_v22  ;;  %v1397_v48 = vadd.f32 %v2594_v39, %v1347_v4 }
 0x225   :  { %v1429_v14 = vmax.f32 %v1397_v48, 0.0 }
 0x226   :  { %v1544_v7 = vpop.f32.mrf.mxu0 }
 0x227   :  { %v1545_v27 = vadd.f32 %v2652_v21, %v1544_v7 }
 0x228   :  { %v1348_v1 = vpop.f32.mrf.mxu3 }
 0x229   :  { %v1617_v5 = vmax.f32 %v1545_v27, 0.0  ;;  %v1349_v32 = vadd.f32 %v1348_v1, %v1211_v49  ;;  %v1226_v49 = vpop.f32.mrf.mxu2 }
 0x22b   :  { %1649 = vst [vmem:[%s2805_s9 + $0x28] sm:$0xff] %v1617_v5  ;;  %v1398_v6 = vadd.f32 %v2594_v39, %v1349_v32 }
 0x22d   :  { %v1430_v56 = vmax.f32 %v1398_v6, 0.0 }
 0x22e   :  { %v1547_v11 = vpop.f32.mrf.mxu0 }
 0x22f   :  { %v1548_v30 = vadd.f32 %v2652_v21, %v1547_v11  ;;  %v1450_v16 = vpack.c.bf16 %v1430_v56, %v1429_v14 }
 0x230   :  { %v1351_v8 = vpop.f32.mrf.mxu3 }
 0x231   :  { %v1618_v18 = vmax.f32 %v1548_v30, 0.0  ;;  %1586 = vmatmul.bf16.gmra.mxu0 %v1450_v16  ;;  %v1352_v47 = vadd.f32 %v1351_v8, %v1214_v2  ;;  %v1229_v22 = vpop.f32.mrf.mxu2 }
 0x233   :  { %1650 = vst [vmem:[%s2805_s9 + $0x30] sm:$0xff] %v1618_v18  ;;  %v1399_v12 = vadd.f32 %v2594_v39, %v1352_v47 }
 0x235   :  { %v1431_v13 = vmax.f32 %v1399_v12, 0.0 }
 0x236   :  { %v1549_v60 = vpop.f32.mrf.mxu0 }
 0x237   :  { %v1550_v15 = vadd.f32 %v2652_v21, %v1549_v60 }
 0x238   :  { %v1353_v20 = vpop.f32.mrf.mxu3 }
 0x239   :  { %v1619_v24 = vmax.f32 %v1550_v15, 0.0  ;;  %v1354_v29 = vadd.f32 %v1353_v20, %v1216_v40  ;;  %v1231_v6 = vpop.f32.mrf.mxu2 }
 0x23b   :  { %1651 = vst [vmem:[%s2805_s9 + $0x38] sm:$0xff] %v1619_v24  ;;  %v1400_v25 = vadd.f32 %v2594_v39, %v1354_v29 }
 0x23d   :  { %v1432_v19 = vmax.f32 %v1400_v25, 0.0 }
 0x23e   :  { %v1552_v35 = vpop.f32.mrf.mxu0 }
 0x23f   :  { %v1553_v42 = vadd.f32 %v2652_v21, %v1552_v35  ;;  %v1451_v36 = vpack.c.bf16 %v1432_v19, %v1431_v13 }
 0x240   :  { %v1356_v38 = vpop.f32.mrf.mxu3 }
 0x241   :  { %v1620_v28 = vmax.f32 %v1553_v42, 0.0  ;;  %1591 = vmatmul.bf16.gmra.mxu0 %v1451_v36  ;;  %v1357_v23 = vadd.f32 %v1356_v38, %v1219_v9 }
 0x243   :  { %1652 = vst [vmem:[%s2805_s9 + $0x40] sm:$0xff] %v1620_v28  ;;  %v1401_v44 = vadd.f32 %v2594_v39, %v1357_v23 }
 0x245   :  { %v1433_v46 = vmax.f32 %v1401_v44, 0.0 }
 0x246   :  { %v1554_v31 = vpop.f32.mrf.mxu0 }
 0x247   :  { %v1555_v41 = vadd.f32 %v2652_v21, %v1554_v31 }
 0x248   :  { %v1358_v10 = vpop.f32.mrf.mxu3 }
 0x249   :  { %v1621_v50 = vmax.f32 %v1555_v41, 0.0  ;;  %v1359_v34 = vadd.f32 %v1358_v10, %v1221_v37 }
 0x24b   :  { %1653 = vst [vmem:[%s2805_s9 + $0x48] sm:$0xff] %v1621_v50  ;;  %v1402_v45 = vadd.f32 %v2594_v39, %v1359_v34 }
 0x24d   :  { %v1434_v52 = vmax.f32 %v1402_v45, 0.0 }
 0x24e   :  { %v1557_v17 = vpop.f32.mrf.mxu0 }
 0x24f   :  { %v1558_v55 = vadd.f32 %v2652_v21, %v1557_v17  ;;  %v1452_v43 = vpack.c.bf16 %v1434_v52, %v1433_v46 }
 0x250   :  { %v1361_v54 = vpop.f32.mrf.mxu3 }
 0x251   :  { %v1622_v3 = vmax.f32 %v1558_v55, 0.0  ;;  %1596 = vmatmul.bf16.gmra.mxu0 %v1452_v43  ;;  %v1362_v26 = vadd.f32 %v1361_v54, %v1224_v33 }
 0x253   :  { %1654 = vst [vmem:[%s2805_s9 + $0x50] sm:$0xff] %v1622_v3  ;;  %v1403_v53 = vadd.f32 %v2594_v39, %v1362_v26 }
 0x255   :  { %v1435_v0 = vmax.f32 %v1403_v53, 0.0 }
 0x256   :  { %v1559_v57 = vpop.f32.mrf.mxu0 }
 0x257   :  { %v1560_v58 = vadd.f32 %v2652_v21, %v1559_v57 }
 0x258   :  { %v1363_v59 = vpop.f32.mrf.mxu3 }
 0x259   :  { %v1623_v61 = vmax.f32 %v1560_v58, 0.0  ;;  %v1364_v51 = vadd.f32 %v1363_v59, %v1226_v49 }
 0x25b   :  { %1655 = vst [vmem:[%s2805_s9 + $0x58] sm:$0xff] %v1623_v61  ;;  %v1404_v63 = vadd.f32 %v2594_v39, %v1364_v51 }
 0x25d   :  { %v1436_v62 = vmax.f32 %v1404_v63, 0.0 }
 0x25e   :  { %v1562_v2 = vpop.f32.mrf.mxu0 }
 0x25f   :  { %v1563_v4 = vadd.f32 %v2652_v21, %v1562_v2  ;;  %v1453_v7 = vpack.c.bf16 %v1436_v62, %v1435_v0 }
 0x260   :  { %v1366_v27 = vpop.f32.mrf.mxu3 }
 0x261   :  { %v1624_v1 = vmax.f32 %v1563_v4, 0.0  ;;  %1601 = vmatmul.bf16.gmra.mxu0 %v1453_v7  ;;  %v1367_v48 = vadd.f32 %v1366_v27, %v1229_v22 }
 0x263   :  { %1656 = vst [vmem:[%s2805_s9 + $0x60] sm:$0xff] %v1624_v1  ;;  %v1405_v14 = vadd.f32 %v2594_v39, %v1367_v48 }
 0x265   :  { %v1437_v16 = vmax.f32 %v1405_v14, 0.0 }
 0x266   :  { %v1564_v5 = vpop.f32.mrf.mxu0 }
 0x267   :  { %v1565_v32 = vadd.f32 %v2652_v21, %v1564_v5 }
 0x268   :  { %v1368_v40 = vpop.f32.mrf.mxu3 }
 0x269   :  { %v1625_v56 = vmax.f32 %v1565_v32, 0.0  ;;  %v1369_v11 = vadd.f32 %v1368_v40, %v1231_v6 }
 0x26b   :  { %1657 = vst [vmem:[%s2805_s9 + $0x68] sm:$0xff] %v1625_v56  ;;  %v1406_v30 = vadd.f32 %v2594_v39, %v1369_v11 }
 0x26d   :  { %v1438_v8 = vmax.f32 %v1406_v30, 0.0 }
 0x26e   :  { %v1567_v18 = vpop.f32.mrf.mxu0 }
 0x26f   :  { %v1568_v47 = vadd.f32 %v2652_v21, %v1567_v18  ;;  %v1454_v60 = vpack.c.bf16 %v1438_v8, %v1437_v16 }
 0x271   :  { %v1626_v9 = vmax.f32 %v1568_v47, 0.0  ;;  %1606 = vmatmul.bf16.gmra.mxu0 %v1454_v60 }
 0x273   :  { %1658 = vst [vmem:[%s2805_s9 + $0x70] sm:$0xff] %v1626_v9 }
 0x276   :  { %v1569_v15 = vpop.f32.mrf.mxu0 }
 0x277   :  { %v1570_v20 = vadd.f32 %v2652_v21, %v1569_v15 }
 0x279   :  { %v1627_v12 = vmax.f32 %v1570_v20, 0.0 }
 0x27b   :  { %1659 = vst [vmem:[%s2805_s9 + $0x78] sm:$0xff] %v1627_v12 }
 0x27e   :  { %v1572_v39 = vpop.f32.mrf.mxu0 }
 0x27f   :  { %v1573_v24 = vadd.f32 %v2652_v21, %v1572_v39 }
 0x281   :  { %v1628_v29 = vmax.f32 %v1573_v24, 0.0 }
 0x283   :  { %1660 = vst [vmem:[%s2805_s9 + $0x80] sm:$0xff] %v1628_v29 }
 0x286   :  { %v1574_v25 = vpop.f32.mrf.mxu0 }
 0x287   :  { %v1575_v13 = vadd.f32 %v2652_v21, %v1574_v25 }
 0x289   :  { %v1629_v19 = vmax.f32 %v1575_v13, 0.0 }
 0x28b   :  { %1661 = vst [vmem:[%s2805_s9 + $0x88] sm:$0xff] %v1629_v19 }
 0x28e   :  { %v1577_v35 = vpop.f32.mrf.mxu0 }
 0x28f   :  { %v1578_v42 = vadd.f32 %v2652_v21, %v1577_v35 }
 0x291   :  { %v1630_v36 = vmax.f32 %v1578_v42, 0.0 }
 0x293   :  { %1662 = vst [vmem:[%s2805_s9 + $0x90] sm:$0xff] %v1630_v36 }
 0x296   :  { %v1579_v37 = vpop.f32.mrf.mxu0 }
 0x297   :  { %v1580_v38 = vadd.f32 %v2652_v21, %v1579_v37 }
 0x299   :  { %v1631_v28 = vmax.f32 %v1580_v38, 0.0 }
 0x29b   :  { %1663 = vst [vmem:[%s2805_s9 + $0x98] sm:$0xff] %v1631_v28 }
 0x29e   :  { %v1582_v23 = vpop.f32.mrf.mxu0 }
 0x29f   :  { %v1583_v31 = vadd.f32 %v2652_v21, %v1582_v23 }
 0x2a1   :  { %v1632_v41 = vmax.f32 %v1583_v31, 0.0 }
 0x2a3   :  { %1664 = vst [vmem:[%s2805_s9 + $0xa0] sm:$0xff] %v1632_v41 }
 0x2a6   :  { %v1584_v10 = vpop.f32.mrf.mxu0 }
 0x2a7   :  { %v1585_v44 = vadd.f32 %v2652_v21, %v1584_v10 }
 0x2a9   :  { %v1633_v50 = vmax.f32 %v1585_v44, 0.0 }
 0x2ab   :  { %1665 = vst [vmem:[%s2805_s9 + $0xa8] sm:$0xff] %v1633_v50 }
 0x2ae   :  { %v1587_v34 = vpop.f32.mrf.mxu0 }
 0x2af   :  { %v1588_v33 = vadd.f32 %v2652_v21, %v1587_v34 }
 0x2b1   :  { %v1634_v45 = vmax.f32 %v1588_v33, 0.0 }
 0x2b3   :  { %1666 = vst [vmem:[%s2805_s9 + $0xb0] sm:$0xff] %v1634_v45 }
 0x2b6   :  { %v1589_v46 = vpop.f32.mrf.mxu0 }
 0x2b7   :  { %v1590_v52 = vadd.f32 %v2652_v21, %v1589_v46 }
 0x2b9   :  { %v1635_v17 = vmax.f32 %v1590_v52, 0.0 }
 0x2bb   :  { %1667 = vst [vmem:[%s2805_s9 + $0xb8] sm:$0xff] %v1635_v17 }
 0x2be   :  { %v1592_v55 = vpop.f32.mrf.mxu0 }
 0x2bf   :  { %v1593_v43 = vadd.f32 %v2652_v21, %v1592_v55 }
 0x2c1   :  { %v1636_v54 = vmax.f32 %v1593_v43, 0.0 }
 0x2c3   :  { %1668 = vst [vmem:[%s2805_s9 + $0xc0] sm:$0xff] %v1636_v54 }
 0x2c6   :  { %v1594_v3 = vpop.f32.mrf.mxu0 }
 0x2c7   :  { %v1595_v49 = vadd.f32 %v2652_v21, %v1594_v3 }
 0x2c9   :  { %v1637_v26 = vmax.f32 %v1595_v49, 0.0 }
 0x2cb   :  { %1669 = vst [vmem:[%s2805_s9 + $0xc8] sm:$0xff] %v1637_v26 }
 0x2ce   :  { %v1597_v57 = vpop.f32.mrf.mxu0 }
 0x2cf   :  { %v1598_v58 = vadd.f32 %v2652_v21, %v1597_v57 }
 0x2d1   :  { %v1638_v59 = vmax.f32 %v1598_v58, 0.0 }
 0x2d3   :  { %1670 = vst [vmem:[%s2805_s9 + $0xd0] sm:$0xff] %v1638_v59 }
 0x2d6   :  { %v1599_v53 = vpop.f32.mrf.mxu0 }
 0x2d7   :  { %v1600_v61 = vadd.f32 %v2652_v21, %v1599_v53 }
 0x2d9   :  { %v1639_v51 = vmax.f32 %v1600_v61, 0.0 }
 0x2db   :  { %1671 = vst [vmem:[%s2805_s9 + $0xd8] sm:$0xff] %v1639_v51 }
 0x2de   :  { %v1602_v63 = vpop.f32.mrf.mxu0 }
 0x2df   :  { %v1603_v0 = vadd.f32 %v2652_v21, %v1602_v63 }
 0x2e1   :  { %v1640_v62 = vmax.f32 %v1603_v0, 0.0 }
 0x2e3   :  { %1672 = vst [vmem:[%s2805_s9 + $0xe0] sm:$0xff] %v1640_v62 }
 0x2e6   :  { %v1604_v22 = vpop.f32.mrf.mxu0 }
 0x2e7   :  { %v1605_v2 = vadd.f32 %v2652_v21, %v1604_v22 }
 0x2e9   :  { %v1641_v4 = vmax.f32 %v1605_v2, 0.0 }
 0x2eb   :  { %1673 = vst [vmem:[%s2805_s9 + $0xe8] sm:$0xff] %v1641_v4 }
 0x2ee   :  { %v1607_v7 = vpop.f32.mrf.mxu0 }
 0x2ef   :  { %v1608_v27 = vadd.f32 %v2652_v21, %v1607_v7 }
 0x2f1   :  { %v1642_v1 = vmax.f32 %v1608_v27, 0.0 }
 0x2f3   :  { %1674 = vst [vmem:[%s2805_s9 + $0xf0] sm:$0xff] %v1642_v1 }
 0x2f6   :  { %v1609_v48 = vpop.f32.mrf.mxu0 }
 0x2f7   :  { %v1610_v5 = vadd.f32 %v2652_v21, %v1609_v48 }
 0x2f9   :  { %v1643_v32 = vmax.f32 %v1610_v5, 0.0 }
 0x2fb   :  { %1675 = vst [vmem:[%s2805_s9 + $0xf8] sm:$0xff] %v1643_v32 }

</bundles_post_ra>
